<compile_context>
chip_gen: v6e
topology: v6e:2x2x1
jax: 0.10.0
libtpu: 0.0.40
codegen_flags: <defaults>
</compile_context>

<pallas_src>
import functools

import jax
import jax.numpy as jnp
from jax.experimental import pallas as pl
from jax.experimental.pallas import tpu as pltpu

_LANE = 128
_MiB = 1024 * 1024
# Keep the adjacency resident in VMEM (single HBM pass) only when the whole
# kernel footprint stays well inside v7x's 64 MiB physical VMEM (and hence
# trivially inside v5e/v6e's 128 MiB).
_ADJ_RESIDENT_BUDGET = 44 * _MiB


# ------------------------------ small helpers -------------------------------

def _ceil_to(v, m):
    return ((v + m - 1) // m) * m


def _pad2d(a, rows, cols):
    r, c = a.shape
    return jnp.pad(a, ((0, rows - r), (0, cols - c)))


# ------------------------------ fused kernel --------------------------------

def _fused_gcn_kernel(*refs, enc, tm, adj_resident):
    has_gc2 = enc in (0, 1, 2)
    has_fc = enc in (0, 1, 3)

    it = iter(refs)
    adj_ref = next(it)    # (tm, Np)  bf16  adjacency row strip
    s1_ref = next(it)     # (Np, Hp)  bf16  support1 = x @ W1 (precomputed)
    b1_ref = next(it)     # (1, Hp)   f32
    w2_ref = next(it) if has_gc2 else None
    b2_ref = next(it) if has_gc2 else None
    wf_ref = next(it) if has_fc else None
    bf_ref = next(it) if has_fc else None
    xout_ref = next(it)   # (tm, Xp)  f32 output strip
    out_ref = next(it)    # (tm, Op)  f32 output strip
    adj_c = next(it) if adj_resident else None   # (Np, Np) bf16 adj cache
    s2_ref = next(it)     # (Np, S2p) bf16 scratch (enc==3: holds h itself)
    pre1_ref = next(it) if enc == 2 else None     # (Np, Hp) f32 pre-relu gc1

    phase = pl.program_id(0)
    i = pl.program_id(1)
    row0 = pl.multiple_of(i * tm, tm)

    # ---- phase 0: per-strip h and s2 = h @ W2 (no serial bubbles) ----------
    @pl.when(phase == 0)
    def _():
        a = adj_ref[...]
        if adj_resident:
            adj_c[pl.ds(row0, tm), :] = a        # cache strip for phase 1
        pre1 = jnp.dot(a, s1_ref[...],
                       preferred_element_type=jnp.float32) + b1_ref[...]
        z = jnp.maximum(pre1, 0.0)
        if enc == 2:
            pre1_ref[pl.ds(row0, tm), :] = pre1  # stash: out = gc1 pre-relu
        if enc == 3:
            s2_ref[pl.ds(row0, tm), :] = z.astype(s2_ref.dtype)
        else:
            s2_ref[pl.ds(row0, tm), :] = jnp.dot(
                z.astype(w2_ref.dtype), w2_ref[...],
                preferred_element_type=jnp.float32).astype(s2_ref.dtype)
        # Output blocks are resident in both phases (index map (i, 0)); write
        # them explicitly here so no stale buffer content is ever flushed.
        xout_ref[...] = jnp.zeros_like(xout_ref)
        out_ref[...] = jnp.zeros_like(out_ref)

    # ---- phase 1: second graph conv / spmm + epilogue, final outputs -------
    @pl.when(phase == 1)
    def _():
        if adj_resident:
            a = adj_c[pl.ds(row0, tm), :]
        else:
            a = adj_ref[...]
        y = jnp.dot(a, s2_ref[...], preferred_element_type=jnp.float32)
        if has_gc2:
            y = y + b2_ref[...]

        if enc == 0:
            # x_out = gc2(h, adj) ; out = fc3(relu(x_out))
            xout_ref[...] = y.astype(xout_ref.dtype)
            z = jnp.maximum(y, 0.0).astype(wf_ref.dtype)
            out_ref[...] = (jnp.dot(z, wf_ref[...],
                                    preferred_element_type=jnp.float32)
                            + bf_ref[...]).astype(out_ref.dtype)
        elif enc == 1:
            # out = gc3(h, adj) ; x_out = fc6(relu(out))
            out_ref[...] = y.astype(out_ref.dtype)
            z = jnp.maximum(y, 0.0).astype(wf_ref.dtype)
            xout_ref[...] = (jnp.dot(z, wf_ref[...],
                                     preferred_element_type=jnp.float32)
                             + bf_ref[...]).astype(xout_ref.dtype)
        elif enc == 2:
            # x_out = gc2(relu(out), adj) ; out = gc1(x, adj) (stashed pre1)
            xout_ref[...] = y.astype(xout_ref.dtype)
            out_ref[...] = pre1_ref[pl.ds(row0, tm), :].astype(out_ref.dtype)
        else:
            # out = adj @ h (torch.spmm as dense matmul) ; x_out = fc6(out)
            out_ref[...] = y.astype(out_ref.dtype)
            xout_ref[...] = (jnp.dot(y.astype(wf_ref.dtype), wf_ref[...],
                                     preferred_element_type=jnp.float32)
                             + bf_ref[...]).astype(xout_ref.dtype)


# -------------------------------- wrapper ------------------------------------

def gcn_forward(params, x, adj, encoder_type):
    """Fused Pallas forward mirroring GCN.forward (eval mode: dropout = id)."""
    n, nfeat = x.shape
    nhid = params["gc1_w"].shape[1]
    nclass = params["gc2_w"].shape[1]
    fc3_out = params["fc3_w"].shape[1]

    fp = _ceil_to(nfeat, _LANE)
    hp = _ceil_to(nhid, _LANE)
    cp = _ceil_to(nclass, _LANE)
    f3p = _ceil_to(fc3_out, _LANE)

    np_ = _ceil_to(n, _LANE)                 # padded node count
    tm = 256 if np_ % 256 == 0 else 128      # full MXU width on v6e/v7x
    nt = np_ // tm

    enc = int(encoder_type)
    has_gc2 = enc in (0, 1, 2)
    has_fc = enc in (0, 1, 3)

    bf16 = jnp.bfloat16
    adj_b = _pad2d(adj, np_, np_).astype(bf16)
    x_b = _pad2d(x, np_, fp).astype(bf16)
    w1 = _pad2d(params["gc1_w"], fp, hp).astype(bf16)
    b1 = _pad2d(params["gc1_b"].reshape(1, -1), 1, hp).astype(jnp.float32)

    # support1 = x @ W1 is tiny (N x Fp x Hp) vs the N^2 adjacency matmuls:
    # compute it once here so the kernel has no serial (phase 0, i==0) bubble
    # and no resident x / W1 blocks.
    s1 = jnp.dot(x_b, w1, preferred_element_type=jnp.float32).astype(bf16)

    def layer_wb(name, fin_p, fout_p):
        w = _pad2d(params[name + "_w"], fin_p, fout_p).astype(bf16)
        b = _pad2d(params[name + "_b"].reshape(1, -1), 1, fout_p
                   ).astype(jnp.float32)
        return w, b

    if enc == 0:
        w2, b2 = layer_wb("gc2", hp, cp)
        wf, bfc = layer_wb("fc3", cp, f3p)
        s2p, xout_pad, out_pad = cp, cp, f3p
        xout_true, out_true = nclass, fc3_out
    elif enc == 1:
        w2, b2 = layer_wb("gc3", hp, hp)
        wf, bfc = layer_wb("fc6", hp, cp)
        s2p, xout_pad, out_pad = hp, cp, hp
        xout_true, out_true = nclass, nhid
    elif enc == 2:
        w2, b2 = layer_wb("gc2", hp, cp)
        wf = bfc = None
        s2p, xout_pad, out_pad = cp, cp, hp
        xout_true, out_true = nclass, nhid
    else:
        w2 = b2 = None
        wf, bfc = layer_wb("fc6", hp, cp)
        s2p, xout_pad, out_pad = hp, cp, hp
        xout_true, out_true = nclass, nhid

    # ---- VMEM budgeting: adjacency residency decision + scoped limit -------
    def vmem_bytes(resident):
        est = 2 * tm * np_ * 2                        # adj strip, double buf
        est += 2 * (np_ * hp * 2 + 8 * hp * 4)        # s1 + b1 (constant blocks)
        if has_gc2:
            est += 2 * (w2.shape[0] * w2.shape[1] * 2 + 8 * w2.shape[1] * 4)
        if has_fc:
            est += 2 * (wf.shape[0] * wf.shape[1] * 2 + 8 * wf.shape[1] * 4)
        est += 2 * tm * (xout_pad + out_pad) * 4      # output strips
        est += np_ * s2p * 2                          # s2 / h scratch
        if enc == 2:
            est += np_ * hp * 4                       # pre1 stash
        if resident:
            est += np_ * np_ * 2                      # adj VMEM cache
        return est

    adj_resident = (nt > 1) and (vmem_bytes(True) <= _ADJ_RESIDENT_BUDGET)
    vmem_est = vmem_bytes(adj_resident)
    vmem_limit = int(min(max(vmem_est * 5 // 4 + 2 * _MiB, 32 * _MiB),
                         96 * _MiB))

    if adj_resident:
        # Phase 0 streams strips (overlapping their DMA with compute) and
        # caches them in VMEM; phase 1 keeps the adj block index pinned, so
        # the adjacency crosses HBM exactly once.
        adj_map = lambda p, i: ((1 - p) * i + p * (nt - 1), 0)
    else:
        adj_map = lambda p, i: (i, 0)     # fallback: stream in both phases

    full = lambda shape: pl.BlockSpec(shape, lambda p, i: (0, 0))

    inputs = [adj_b, s1, b1]
    in_specs = [pl.BlockSpec((tm, np_), adj_map),
                full((np_, hp)), full((1, hp))]
    if has_gc2:
        inputs += [w2, b2]
        in_specs += [full(w2.shape), full(b2.shape)]
    if has_fc:
        inputs += [wf, bfc]
        in_specs += [full(wf.shape), full(bfc.shape)]

    out_shape = (jax.ShapeDtypeStruct((np_, xout_pad), jnp.float32),
                 jax.ShapeDtypeStruct((np_, out_pad), jnp.float32))
    # Row-indexed outputs; every resident visit is written (zeros in phase 0,
    # final values in phase 1), so no stale buffer is ever flushed.
    out_specs = (pl.BlockSpec((tm, xout_pad), lambda p, i: (i, 0)),
                 pl.BlockSpec((tm, out_pad), lambda p, i: (i, 0)))

    scratch = []
    if adj_resident:
        scratch.append(pltpu.VMEM((np_, np_), bf16))      # adjacency cache
    scratch.append(pltpu.VMEM((np_, s2p), bf16))          # s2 (or h for enc 3)
    if enc == 2:
        scratch.append(pltpu.VMEM((np_, hp), jnp.float32))  # pre-relu gc1

    # Advisory cost estimate for XLA scheduling around the fused kernel.
    flops = 2 * np_ * np_ * hp + 2 * np_ * np_ * s2p
    if enc != 3:
        flops += 2 * np_ * hp * s2p
    if has_fc:
        flops += 2 * np_ * wf.shape[0] * wf.shape[1]
    adj_passes = 1 if adj_resident else 2
    bytes_accessed = adj_passes * np_ * np_ * 2
    bytes_accessed += sum(int(a.size) * a.dtype.itemsize for a in inputs[1:])
    bytes_accessed += 2 * 4 * np_ * (xout_pad + out_pad)
    cost = pl.CostEstimate(flops=flops, transcendentals=0,
                           bytes_accessed=bytes_accessed)

    x_out_p, out_p = pl.pallas_call(
        functools.partial(_fused_gcn_kernel, enc=enc, tm=tm,
                          adj_resident=adj_resident),
        grid=(2, nt),
        in_specs=in_specs,
        out_specs=out_specs,
        out_shape=out_shape,
        scratch_shapes=scratch,
        compiler_params=pltpu.CompilerParams(
            # Phase 1 reads scratches written by all phase-0 row steps, so
            # both grid axes must stay sequential on one TensorCore.
            dimension_semantics=("arbitrary", "arbitrary"),
            vmem_limit_bytes=vmem_limit),
        cost_estimate=cost,
    )(*inputs)

    return x_out_p[:n, :xout_true], out_p[:n, :out_true]


# --------------------------- pure-JAX reference ------------------------------

def _ref_forward(params, x, adj, enc):
    """Reference that mirrors the kernel's bf16-input / f32-accumulate casts."""
    bf16, f32 = jnp.bfloat16, jnp.float32

    def mxu(a, b):
        return jnp.dot(a.astype(bf16), b.astype(bf16),
                       preferred_element_type=f32)

    s1 = mxu(x, params["gc1_w"]).astype(bf16)
    pre1 = mxu(adj, s1) + params["gc1_b"]
    h = jnp.maximum(pre1, 0.0).astype(bf16)

    if enc == 0:
        s2 = mxu(h, params["gc2_w"]).astype(bf16)
        x_out = mxu(adj, s2) + params["gc2_b"]
        out = mxu(jnp.maximum(x_out, 0.0), params["fc3_w"]) + params["fc3_b"]
    elif enc == 1:
        s2 = mxu(h, params["gc3_w"]).astype(bf16)
        out = mxu(adj, s2) + params["gc3_b"]
        x_out = mxu(jnp.maximum(out, 0.0), params["fc6_w"]) + params["fc6_b"]
    elif enc == 2:
        out = pre1
        s2 = mxu(h, params["gc2_w"]).astype(bf16)
        x_out = mxu(adj, s2) + params["gc2_b"]
    else:
        out = mxu(adj, h)
        x_out = mxu(out, params["fc6_w"]) + params["fc6_b"]
    return x_out, out


# --------------------------- parameter init ----------------------------------

def init_params(key, nfeat, nhid, nclass):
    ks = jax.random.split(key, 14)

    def uniform(k, shape, bound):
        return jax.random.uniform(
            k, shape, dtype=jnp.float32, minval=-bound, maxval=bound)

    def gcn_init(kw, kb, fin, fout):
        stdv = 1.0 / (fout ** 0.5)   # GraphConvolution.reset_parameters
        return uniform(kw, (fin, fout), stdv), uniform(kb, (fout,), stdv)

    def linear_init(kw, kb, fin, fout):
        bound = 1.0 / (fin ** 0.5)   # nn.Linear default; stored as (in, out)
        return uniform(kw, (fin, fout), bound), uniform(kb, (fout,), bound)

    p = {}
    p["gc1_w"], p["gc1_b"] = gcn_init(ks[0], ks[1], nfeat, nhid)
    p["gc2_w"], p["gc2_b"] = gcn_init(ks[2], ks[3], nhid, nclass)
    p["gc3_w"], p["gc3_b"] = gcn_init(ks[4], ks[5], nhid, nhid)
    p["fc3_w"], p["fc3_b"] = linear_init(ks[6], ks[7], nclass, 256)
    p["fc4_w"], p["fc4_b"] = linear_init(ks[8], ks[9], nhid, nhid)    # unused in forward
    p["fc5_w"], p["fc5_b"] = linear_init(ks[10], ks[11], nhid, nhid)  # unused in forward
    p["fc6_w"], p["fc6_b"] = linear_init(ks[12], ks[13], nhid, nclass)
    return p


# ---------------------------------- main --------------------------------------

if __name__ == "__main__":
    # N=300 exercises the N-padding (-> 384), tm=128, nt=3 grid and the
    # VMEM-resident adjacency path; feature dims exercise lane padding.
    N, NFEAT, NHID, NCLASS = 300, 40, 20, 7

    key = jax.random.PRNGKey(0)
    k_x, k_adj, k_params = jax.random.split(key, 3)

    x = jax.random.normal(k_x, (N, NFEAT), dtype=jnp.float32)

    # Symmetric, row-normalized dense adjacency with self loops.
    a = (jax.random.uniform(k_adj, (N, N)) > 0.9).astype(jnp.float32)
    a = jnp.maximum(a, a.T) + jnp.eye(N, dtype=jnp.float32)
    adj = a / jnp.sum(a, axis=1, keepdims=True)

    params = init_params(k_params, NFEAT, NHID, NCLASS)

    results = []
    ok = True
    for enc in (0, 1, 2, 3):
        x_out, out = gcn_forward(params, x, adj, enc)
        x_ref, o_ref = _ref_forward(params, x, adj, enc)
        results += [x_out, out]
        ok &= bool(jnp.allclose(x_out, x_ref, rtol=2e-2, atol=2e-2))
        ok &= bool(jnp.allclose(out, o_ref, rtol=2e-2, atol=2e-2))

    jax.block_until_ready(results)
    if not ok:
        raise SystemExit("numerical mismatch vs reference")
    print("KERNEL_OK")
</pallas_src>

<mosaic_0001>
module attributes {stable_mosaic.version = 11 : i64} {
  func.func @_fused_gcn_kernel(%arg0: i32, %arg1: i32, %arg2: memref<128x384xbf16, #tpu.memory_space<vmem>>, %arg3: memref<384x128xbf16, #tpu.memory_space<vmem>>, %arg4: memref<1x128xf32, #tpu.memory_space<vmem>>, %arg5: memref<128x128xbf16, #tpu.memory_space<vmem>>, %arg6: memref<1x128xf32, #tpu.memory_space<vmem>>, %arg7: memref<128x256xbf16, #tpu.memory_space<vmem>>, %arg8: memref<1x256xf32, #tpu.memory_space<vmem>>, %arg9: memref<128x128xf32, #tpu.memory_space<vmem>>, %arg10: memref<128x256xf32, #tpu.memory_space<vmem>>, %arg11: memref<384x384xbf16, #tpu.memory_space<vmem>>, %arg12: memref<384x128xbf16, #tpu.memory_space<vmem>>) attributes {dimension_semantics = [#tpu.dimension_semantics<arbitrary>, #tpu.dimension_semantics<arbitrary>], iteration_bounds = array<i64: 2, 3>, scalar_prefetch = 0 : i64, scratch_operands = 2 : i64, tpu.core_type = #tpu.core_type<tc>, window_params = [{transform_indices = @transform_0, window_bounds = array<i64: 128, 384>}, {pipeline_mode = #tpu.pipeline_mode<synchronous>, transform_indices = @transform_1, window_bounds = array<i64: 384, 128>}, {pipeline_mode = #tpu.pipeline_mode<synchronous>, transform_indices = @transform_2, window_bounds = array<i64: 1, 128>}, {pipeline_mode = #tpu.pipeline_mode<synchronous>, transform_indices = @transform_3, window_bounds = array<i64: 128, 128>}, {pipeline_mode = #tpu.pipeline_mode<synchronous>, transform_indices = @transform_4, window_bounds = array<i64: 1, 128>}, {pipeline_mode = #tpu.pipeline_mode<synchronous>, transform_indices = @transform_5, window_bounds = array<i64: 128, 256>}, {pipeline_mode = #tpu.pipeline_mode<synchronous>, transform_indices = @transform_6, window_bounds = array<i64: 1, 256>}, {transform_indices = @transform_7, window_bounds = array<i64: 128, 128>}, {transform_indices = @transform_8, window_bounds = array<i64: 128, 256>}]} {
    %c128_i32 = arith.constant 128 : i32
    %0 = arith.muli %arg1, %c128_i32 : i32
    %1 = tpu.assume_multiple %0, 128 : i32
    %c0_i32 = arith.constant 0 : i32
    %2 = arith.cmpi eq, %arg0, %c0_i32 : i32
    %3 = arith.extui %2 : i1 to i32
    %c0_i32_0 = arith.constant 0 : i32
    %4 = arith.cmpi ne, %3, %c0_i32_0 : i32
    scf.if %4 {
      %c0 = arith.constant 0 : index
      %c0_2 = arith.constant 0 : index
      %8 = vector.load %arg2[%c0, %c0_2] : memref<128x384xbf16, #tpu.memory_space<vmem>>, vector<128x384xbf16>
      %9 = arith.index_cast %1 : i32 to index
      %c0_3 = arith.constant 0 : index
      %10 = vector.load %arg11[%9, %c0_3] : memref<384x384xbf16, #tpu.memory_space<vmem>>, vector<128x384xbf16>
      tpu.vector_store %arg11[%9, %c0_3], %8 {strides = array<i32>} : memref<384x384xbf16, #tpu.memory_space<vmem>>, vector<128x384xbf16>,
      %c0_4 = arith.constant 0 : index
      %c0_5 = arith.constant 0 : index
      %11 = vector.load %arg3[%c0_4, %c0_5] : memref<384x128xbf16, #tpu.memory_space<vmem>>, vector<384x128xbf16>
      %cst = arith.constant dense<0.000000e+00> : vector<128x128xf32>
      %12 = tpu.matmul %8, %11, %cst {dimension_numbers = #tpu.dot_dimension_numbers<[1], [0], [0], [1], [0, 0, 1, 1], [], []>} : vector<128x384xbf16>, vector<384x128xbf16>, vector<128x128xf32> -> vector<128x128xf32>
      %c0_6 = arith.constant 0 : index
      %c0_7 = arith.constant 0 : index
      %13 = vector.load %arg4[%c0_6, %c0_7] : memref<1x128xf32, #tpu.memory_space<vmem>>, vector<1x128xf32>
      %14 = vector.broadcast %13 : vector<1x128xf32> to vector<128x128xf32>
      %15 = arith.addf %12, %14 : vector<128x128xf32>
      %cst_8 = arith.constant 0.000000e+00 : f32
      %16 = vector.broadcast %cst_8 : f32 to vector<128x128xf32>
      %17 = arith.maximumf %15, %16 : vector<128x128xf32>
      %18 = arith.truncf %17 : vector<128x128xf32> to vector<128x128xbf16>
      %c0_9 = arith.constant 0 : index
      %c0_10 = arith.constant 0 : index
      %19 = vector.load %arg5[%c0_9, %c0_10] : memref<128x128xbf16, #tpu.memory_space<vmem>>, vector<128x128xbf16>
      %cst_11 = arith.constant dense<0.000000e+00> : vector<128x128xf32>
      %20 = tpu.matmul %18, %19, %cst_11 {dimension_numbers = #tpu.dot_dimension_numbers<[1], [0], [0], [1], [0, 0, 1, 1], [], []>} : vector<128x128xbf16>, vector<128x128xbf16>, vector<128x128xf32> -> vector<128x128xf32>
      %21 = arith.truncf %20 : vector<128x128xf32> to vector<128x128xbf16>
      %22 = arith.index_cast %1 : i32 to index
      %c0_12 = arith.constant 0 : index
      %23 = vector.load %arg12[%22, %c0_12] : memref<384x128xbf16, #tpu.memory_space<vmem>>, vector<128x128xbf16>
      tpu.vector_store %arg12[%22, %c0_12], %21 {strides = array<i32>} : memref<384x128xbf16, #tpu.memory_space<vmem>>, vector<128x128xbf16>,
      %cst_13 = arith.constant 0.000000e+00 : f32
      %24 = vector.broadcast %cst_13 : f32 to vector<128x128xf32>
      %c0_14 = arith.constant 0 : index
      %c0_15 = arith.constant 0 : index
      %25 = vector.load %arg9[%c0_14, %c0_15] : memref<128x128xf32, #tpu.memory_space<vmem>>, vector<128x128xf32>
      tpu.vector_store %arg9[%c0_14, %c0_15], %24 {strides = array<i32>} : memref<128x128xf32, #tpu.memory_space<vmem>>, vector<128x128xf32>,
      %cst_16 = arith.constant 0.000000e+00 : f32
      %26 = vector.broadcast %cst_16 : f32 to vector<128x256xf32>
      %c0_17 = arith.constant 0 : index
      %c0_18 = arith.constant 0 : index
      %27 = vector.load %arg10[%c0_17, %c0_18] : memref<128x256xf32, #tpu.memory_space<vmem>>, vector<128x256xf32>
      tpu.vector_store %arg10[%c0_17, %c0_18], %26 {strides = array<i32>} : memref<128x256xf32, #tpu.memory_space<vmem>>, vector<128x256xf32>,
    } else {
    }
    %c1_i32 = arith.constant 1 : i32
    %5 = arith.cmpi eq, %arg0, %c1_i32 : i32
    %6 = arith.extui %5 : i1 to i32
    %c0_i32_1 = arith.constant 0 : i32
    %7 = arith.cmpi ne, %6, %c0_i32_1 : i32
    scf.if %7 {
      %8 = arith.index_cast %1 : i32 to index
      %c0 = arith.constant 0 : index
      %9 = vector.load %arg11[%8, %c0] : memref<384x384xbf16, #tpu.memory_space<vmem>>, vector<128x384xbf16>
      %c0_2 = arith.constant 0 : index
      %c0_3 = arith.constant 0 : index
      %10 = vector.load %arg12[%c0_2, %c0_3] : memref<384x128xbf16, #tpu.memory_space<vmem>>, vector<384x128xbf16>
      %cst = arith.constant dense<0.000000e+00> : vector<128x128xf32>
      %11 = tpu.matmul %9, %10, %cst {dimension_numbers = #tpu.dot_dimension_numbers<[1], [0], [0], [1], [0, 0, 1, 1], [], []>} : vector<128x384xbf16>, vector<384x128xbf16>, vector<128x128xf32> -> vector<128x128xf32>
      %c0_4 = arith.constant 0 : index
      %c0_5 = arith.constant 0 : index
      %12 = vector.load %arg6[%c0_4, %c0_5] : memref<1x128xf32, #tpu.memory_space<vmem>>, vector<1x128xf32>
      %13 = vector.broadcast %12 : vector<1x128xf32> to vector<128x128xf32>
      %14 = arith.addf %11, %13 : vector<128x128xf32>
      %c0_6 = arith.constant 0 : index
      %c0_7 = arith.constant 0 : index
      %15 = vector.load %arg9[%c0_6, %c0_7] : memref<128x128xf32, #tpu.memory_space<vmem>>, vector<128x128xf32>
      tpu.vector_store %arg9[%c0_6, %c0_7], %14 {strides = array<i32>} : memref<128x128xf32, #tpu.memory_space<vmem>>, vector<128x128xf32>,
      %cst_8 = arith.constant 0.000000e+00 : f32
      %16 = vector.broadcast %cst_8 : f32 to vector<128x128xf32>
      %17 = arith.maximumf %14, %16 : vector<128x128xf32>
      %18 = arith.truncf %17 : vector<128x128xf32> to vector<128x128xbf16>
      %c0_9 = arith.constant 0 : index
      %c0_10 = arith.constant 0 : index
      %19 = vector.load %arg7[%c0_9, %c0_10] : memref<128x256xbf16, #tpu.memory_space<vmem>>, vector<128x256xbf16>
      %cst_11 = arith.constant dense<0.000000e+00> : vector<128x256xf32>
      %20 = tpu.matmul %18, %19, %cst_11 {dimension_numbers = #tpu.dot_dimension_numbers<[1], [0], [0], [1], [0, 0, 1, 1], [], []>} : vector<128x128xbf16>, vector<128x256xbf16>, vector<128x256xf32> -> vector<128x256xf32>
      %c0_12 = arith.constant 0 : index
      %c0_13 = arith.constant 0 : index
      %21 = vector.load %arg8[%c0_12, %c0_13] : memref<1x256xf32, #tpu.memory_space<vmem>>, vector<1x256xf32>
      %22 = vector.broadcast %21 : vector<1x256xf32> to vector<128x256xf32>
      %23 = arith.addf %20, %22 : vector<128x256xf32>
      %c0_14 = arith.constant 0 : index
      %c0_15 = arith.constant 0 : index
      %24 = vector.load %arg10[%c0_14, %c0_15] : memref<128x256xf32, #tpu.memory_space<vmem>>, vector<128x256xf32>
      tpu.vector_store %arg10[%c0_14, %c0_15], %23 {strides = array<i32>} : memref<128x256xf32, #tpu.memory_space<vmem>>, vector<128x256xf32>,
    } else {
    }
    return
  }
  func.func @transform_0(%arg0: i32, %arg1: i32) -> (i32, i32) {
    %c1_i32 = arith.constant 1 : i32
    %0 = arith.subi %c1_i32, %arg0 : i32
    %1 = arith.muli %0, %arg1 : i32
    %c2_i32 = arith.constant 2 : i32
    %2 = arith.muli %arg0, %c2_i32 : i32
    %3 = arith.addi %1, %2 : i32
    %c0_i32 = arith.constant 0 : i32
    %c0_i32_0 = arith.constant 0 : i32
    return %3, %c0_i32 : i32, i32
  }
  func.func @transform_1(%arg0: i32, %arg1: i32) -> (i32, i32) {
    %c0_i32 = arith.constant 0 : i32
    %c0_i32_0 = arith.constant 0 : i32
    %c0_i32_1 = arith.constant 0 : i32
    return %c0_i32, %c0_i32_0 : i32, i32
  }
  func.func @transform_2(%arg0: i32, %arg1: i32) -> (i32, i32) {
    %c0_i32 = arith.constant 0 : i32
    %c0_i32_0 = arith.constant 0 : i32
    %c0_i32_1 = arith.constant 0 : i32
    return %c0_i32, %c0_i32_0 : i32, i32
  }
  func.func @transform_3(%arg0: i32, %arg1: i32) -> (i32, i32) {
    %c0_i32 = arith.constant 0 : i32
    %c0_i32_0 = arith.constant 0 : i32
    %c0_i32_1 = arith.constant 0 : i32
    return %c0_i32, %c0_i32_0 : i32, i32
  }
  func.func @transform_4(%arg0: i32, %arg1: i32) -> (i32, i32) {
    %c0_i32 = arith.constant 0 : i32
    %c0_i32_0 = arith.constant 0 : i32
    %c0_i32_1 = arith.constant 0 : i32
    return %c0_i32, %c0_i32_0 : i32, i32
  }
  func.func @transform_5(%arg0: i32, %arg1: i32) -> (i32, i32) {
    %c0_i32 = arith.constant 0 : i32
    %c0_i32_0 = arith.constant 0 : i32
    %c0_i32_1 = arith.constant 0 : i32
    return %c0_i32, %c0_i32_0 : i32, i32
  }
  func.func @transform_6(%arg0: i32, %arg1: i32) -> (i32, i32) {
    %c0_i32 = arith.constant 0 : i32
    %c0_i32_0 = arith.constant 0 : i32
    %c0_i32_1 = arith.constant 0 : i32
    return %c0_i32, %c0_i32_0 : i32, i32
  }
  func.func @transform_7(%arg0: i32, %arg1: i32) -> (i32, i32) {
    %c0_i32 = arith.constant 0 : i32
    %c0_i32_0 = arith.constant 0 : i32
    return %arg1, %c0_i32 : i32, i32
  }
  func.func @transform_8(%arg0: i32, %arg1: i32) -> (i32, i32) {
    %c0_i32 = arith.constant 0 : i32
    %c0_i32_0 = arith.constant 0 : i32
    return %arg1, %c0_i32 : i32, i32
  }
}

</mosaic_0001>

<bundles_post_ra>
// kernel: tpu_custom_call.1
= control target key start
LH: loop header
LB: loop body
LE: loop exit
PB: predicated region body
PF: predicated region fallthrough
CT: control target
= control target key end

     0   :  { %s4179_s0 = inlined_call_operand.hbm [shape: bf16[384,384], index: 0, kind: input, shape index: {}]   ;;  %s4180_s1 = inlined_call_operand.hbm [shape: bf16[384,128], index: 1, kind: input, shape index: {}]   ;;  %s4181_s2 = inlined_call_operand.vmem [shape: f32[1,128], index: 2, kind: input, shape index: {}]   ;;  %s4182_s3 = inlined_call_operand.hbm [shape: bf16[128,128], index: 3, kind: input, shape index: {}]   ;;  %s4183_s4 = inlined_call_operand.vmem [shape: f32[1,128], index: 4, kind: input, shape index: {}]   ;;  %s4184_s5 = inlined_call_operand.hbm [shape: bf16[128,256], index: 5, kind: input, shape index: {}]   ;;  %s4185_s6 = inlined_call_operand.vmem [shape: f32[1,256], index: 6, kind: input, shape index: {}]   ;;  %s4186_s7 = inlined_call_operand.hbm [shape: f32[384,128], index: 7, kind: output, shape index: {0}]   ;;  %s4187_s8 = inlined_call_operand.hbm [shape: f32[384,256], index: 8, kind: output, shape index: {1}]  }
   0x1   :  { %4200 = sst [smem:[#allocation25_spill]] %s4180_s1 }
   0x2   :  { %4201 = sst [smem:[#allocation26_spill]] %s4181_s2 }
   0x3   :  { %4202 = sst [smem:[#allocation27_spill]] %s4182_s3 }
   0x4   :  { %4203 = sst [smem:[#allocation28_spill]] %s4183_s4 }
   0x5   :  { %4204 = sst [smem:[#allocation29_spill]] %s4184_s5 }
   0x6   :  { %4205 = sst [smem:[#allocation30_spill]] %s4185_s6 }
   0x7   :  { %4206 = sst [smem:[#allocation31_spill]] %s4186_s7 }
   0x8   :  { %4207 = sst [smem:[#allocation32_spill]] %s4187_s8 }
   0x9   :  { %14 = vsyncpa [#allocation5], 0 }
   0xa   :  { %16 = vsyncpa [#allocation5 + $0x1], 0 }
   0xb   :  { %17 = vsyncpa [#allocation8], 0 }
   0xc   :  { %18 = vsyncpa [#allocation11], 0 }
   0xd   :  { %19 = vsyncpa [#allocation6], 0 }
   0xe   :  { %21 = vsyncpa [#allocation6 + $0x1], 0 }
   0xf   :  { %22 = vsyncpa [#allocation14], 0 }
  0x10   :  { %24 = vsyncpa [#allocation14 + $0x1], 0  ;;  %s3512_s27 = smov 0   ;;  %s3514_s28 = smov 0  }
  0x11   :  { %s3516_s29 = smov 0   ;;  %s3518_s30 = smov 0  }
  0x12   :  { %s3520_s9 = smov 0   ;;  %s3522_s10 = smov 0  }
  0x13   :  { %s3524_s11 = smov 0   ;;  %s3526_s12 = smov 0  }
  0x14   :  { %s3528_s13 = smov 0   ;;  %s3530_s14 = smov 0  }
  0x15   :  { %s3532_s15 = smov 0  }
  0x16 LB: > { %4208 = sst [smem:[#allocation20_spill]] %s3407_s27  ;;  %s2366_s16 = sadd.s32 4294967295, %s3447_s15   ;;  %s3447_s15 = sphi %s3532_s15, %s30_s15   ;;  %s3443_s14 = sphi %s3530_s14, %s4247_s14   ;;  %s3439_s13 = sphi %s3528_s13, %s4246_s13   ;;  %s3435_s12 = sphi %s3526_s12, %s4238_s12   ;;  %s3431_s11 = sphi %s3524_s11, %s4237_s11   ;;  %s3427_s10 = sphi %s3522_s10, %s4245_s10   ;;  %s3423_s9 = sphi %s3520_s9, %s4244_s9   ;;  %s3419_s30 = sphi %s3518_s30, %s4243_s30   ;;  %s3415_s29 = sphi %s3516_s29, %s4242_s29   ;;  %s3411_s28 = sphi %s3514_s28, %s4241_s28   ;;  %s3407_s27 = sphi %s3512_s27, %s4240_s27  }
  0x17   : > { %4209 = sst [smem:[#allocation21_spill]] %s3439_s13  ;;  %s2367_s17 = sadd.s32 4294967294, %s3447_s15  }
  0x18   : > { %4210 = sst [smem:[#allocation22_spill]] %s3443_s14  ;;  %p70_p0 = scmp.ne.s32.totalorder %s3423_s9, %s3419_s30 }
  0x19   : > { %p3568_p1 = scmp.eq.s32.totalorder %s2366_s16, 0  ;;  %p219_p2 = scmp.ne.s32.totalorder %s3415_s29, %s3411_s28 }
  0x1a   : > { %p220_p4 = scmp.eq.s32.totalorder %s2366_s16, 5  ;;  %p225_p5 = scmp.ne.s32.totalorder %s3411_s28, %s3407_s27 }
  0x1b   : > { %s4211_s18 = scalar_select %p3568_p1, 1, 0 }
  0x1c   : > { %p3577_p3 = por %p3568_p1, %p70_p0  ;;  %p226_p6 = scmp.eq.s32.totalorder %s2367_s17, 5 }
  0x1d   : > { %p3583_p7 = por %p220_p4, %p219_p2  ;;  %p2370_p8 = scmp.ge.s32.totalorder %s3447_s15, 1 }
  0x1e   : > { %s4212_s20 = scalar_select %p3577_p3, 1, 0 }
  0x1f   : > { %s4213_s21 = scalar_select %p3583_p7, 1, 0 }
  0x20   : > { %p3588_p9 = por %p226_p6, %p225_p5  ;;  %p259_p10 = scmp.lt.s32.totalorder %s3447_s15, 7 }
  0x21   : > { %4214 = sst [smem:[#allocation23_spill]] %s4213_s21  ;;  %s3449_s24 = smov [#allocation7]  }
  0x22   : > { %s4215_s22 = scalar_select %p3588_p9, 1, 0 }
  0x23   : > { %p3593_p11 = pnand %p2370_p8, %p259_p10  ;;  %s271_s25 = sshll.u32 %s3449_s24, 4  ;;  %s272_s25 = int_to_ptr.vmem [resolvable:$true] %s271_s25 }
  0x24   : > { %4216 = sst [smem:[#allocation24_spill]] %s4215_s22  ;;  %s3450_s30 = smov [#allocation9]  }
  0x25   : > { %p2915_p12 = pneg %p3593_p11  ;;  %s287_s16 = sshll.u32 %s3450_s30, 4  ;;  %s288_s16 = int_to_ptr.vmem [resolvable:$true] %s287_s16 }
  0x26   : > { %s3451_s17 = smov [#allocation10]   ;;  %s3194_s22 = scalar_lea.vmem %s272_s25, 3072 }
  0x27   : > { %p3601_p13 = pnand %p2915_p12, %p3568_p1  ;;  %s303_s19 = sshll.u32 %s3451_s17, 4  ;;  %s304_s19 = int_to_ptr.vmem [resolvable:$true] %s303_s19 }
  0x28   : > { %p3195_p2 = scmp.ne.s32.totalorder %s272_s25, %s3194_s22  ;;  %p3202_p6 = scmp.lt.s32.totalorder %s272_s25, %s272_s25 }
  0x29   : > { %p3185_p0 = pneg %p3601_p13  ;;  %p3203_p8 = scmp.lt.s32.totalorder %s3194_s22, %s3194_s22 }
  0x2b   : > { %p3197_p4 = pnand %p3195_p2, %p3185_p0  ;;  %p3204_p10 = por %p3203_p8, %p3202_p6 }
  0x2d   : > { %p3198_p5 = pneg %p3197_p4 }
  0x2f   : > { %p3205_p12 = pnand %p3204_p10, %p3198_p5 }
  0x31   : > { %3208 = shalt.err (!%p3205_p12)
}
  0x32   : > { %s3452_s24 = smov 64   ;;  %s3453_s30 = smov 4  }
  0x33   : > { %s4219_s1 = sld [smem:[#allocation25_spill]]  ;;  %s3220_s8 = scalar_lea.vmem %s288_s16, 1024 }
  0x34   : > { %p3221_p9 = scmp.ne.s32.totalorder %s288_s16, %s3220_s8  ;;  %p3228_p7 = scmp.lt.s32.totalorder %s288_s16, %s288_s16 }
  0x35   : > { %p3229_p1 = scmp.lt.s32.totalorder %s3220_s8, %s3220_s8 }
  0x36   : > { %p3223_p2 = pnand %p3221_p9, %p3185_p0 }
  0x37   : > { %p3230_p6 = por %p3229_p1, %p3228_p7 }
  0x38   : > { %p3224_p4 = pneg %p3223_p2 }
  0x39   : > { %2918 = dma.hbm_to_vmem [thread:$0]  (!%p3601_p13), %s4219_s1, 3072, %s272_s25, [#allocation8], %s3452_s24, %s3452_s24, %s3453_s30  }
  0x3a   : > { %p3231_p5 = pnand %p3230_p6, %p3224_p4 }
  0x3c   : > { %3234 = shalt.err (!%p3231_p5)
}
  0x3d   : > { %s4220_s3 = sld [smem:[#allocation27_spill]]  ;;  %s3246_s27 = scalar_lea.vmem %s304_s19, 2048 }
  0x3e   : > { %p3247_p8 = scmp.ne.s32.totalorder %s304_s19, %s3246_s27  ;;  %p3254_p12 = scmp.lt.s32.totalorder %s304_s19, %s304_s19 }
  0x3f   : > { %p3255_p2 = scmp.lt.s32.totalorder %s3246_s27, %s3246_s27 }
  0x40   : > { %p3249_p10 = pnand %p3247_p8, %p3185_p0 }
  0x41   : > { %p3256_p3 = por %p3255_p2, %p3254_p12 }
  0x42   : > { %p3250_p9 = pneg %p3249_p10 }
  0x43   : > { %2921 = dma.hbm_to_vmem [thread:$0]  (!%p3601_p13), %s4220_s3, 1024, %s288_s16, [#allocation8], %s3452_s24, %s3452_s24, %s3453_s30  }
  0x44   : > { %p3257_p1 = pnand %p3256_p3, %p3250_p9 }
  0x46   : > { %3260 = shalt.err (!%p3257_p1)
}
  0x47   : > { %s3454_s8 = smov 128   ;;  %s3455_s7 = smov 8  }
  0x48   : > { %s4221_s5 = sld [smem:[#allocation29_spill]]  ;;  %s39_s24 = sadd.s32 1, %s3439_s13 }
  0x49   : > { %p40_p3 = scmp.ge.s32.totalorder %s39_s24, 3  ;;  %s42_s30 = sadd.s32 1, %s3443_s14 }
  0x4a   : > { %s46_s17 = ssub.s32 1, %s3443_s14  ;;  %s2368_s22 = sshll.u32 %s3443_s14, 1 }
  0x4b   : > { %s4249_s24 = smov (%p40_p3, %s39_s24), 0  ;;  %s4251_s30 = smov (!%p40_p3, %s42_s30), %s3443_s14 }
  0x4c   : > { %s47_s27 = smul.u32 %s3439_s13, %s46_s17  ;;  %s57_s1 = sadd.s32 1, %s3427_s10 }
  0x4d   : > { %p44_p7 = scmp.ge.s32.totalorder %s4251_s30, 2  ;;  %p64_p0 = scmp.ne.s32.totalorder %s3427_s10, %s3423_s9 }
  0x4e   : > { %2924 = dma.hbm_to_vmem [thread:$0]  (!%p3601_p13), %s4221_s5, 2048, %s304_s19, [#allocation11], %s3454_s8, %s3454_s8, %s3455_s7  }
  0x4f   : > { %s49_s26 = sadd.s32 %s2368_s22, %s47_s27  ;;  %p65_p13 = scmp.eq.s32.totalorder %s3447_s15, 0 }
  0x50   : > { %s4253_s30 = smov (%p44_p7, %s4251_s30), 0  ;;  %s206_s8 = ssub.s32 %s3439_s13, %s4249_s24 }
  0x51   : > { %p3645_p4 = por %p65_p13, %p64_p0  ;;  %s50_s7 = ssub.s32 1, %s4253_s30 }
  0x52   : > { %s2369_s25 = sshll.u32 %s4253_s30, 1  ;;  %s51_s16 = smul.u32 %s50_s7, %s4249_s24 }
  0x53   : > { %p207_p6 = scmp.eq.s32.totalorder %s206_s8, 0  ;;  %p2939_p5 = scmp.lt.s32.totalorder %s3447_s15, 6 }
  0x54   : > { %s320_s17 = sand.u32 1, %s3427_s10   ;;  %s53_s22 = sadd.s32 %s2369_s25, %s51_s16 }
  0x55   : > { %s54_s27 = ssub.s32 %s49_s26, %s53_s22  ;;  %s2894_s3 = smul.u32 192, %s320_s17 }
  0x56   : > { %p55_p8 = scmp.eq.s32.totalorder %s54_s27, 0  ;;  %s2895_s5 = smul.u32 3072, %s49_s26 }
  0x57   : > { %s4223_s14 = sadd.s32 1, %s3415_s29  ;;  %s324_s8 = scalar_lea.vmem [#allocation4], %s2894_s3 }
  0x58   : > { %s3659_s21 = scalar_select %p207_p6, %s3415_s29, %s4223_s14  }
  0x59   : > { %s3662_s6 = scalar_select %p55_p8, %s3427_s10, %s57_s1  }
  0x5a   : > { %s3667_s13 = scalar_lea.hbm %s4179_s0, %s2895_s5  ;;  %s336_s7 = sshll.u32 %s324_s8, 4  ;;  %s3675_s7 = int_to_ptr.vmem [resolvable:$true] %s336_s7 }
  0x5b   : > { %p3671_p10 = pnand %p2939_p5, %p3645_p4  ;;  %s3677_s14 = scalar_lea.sflag [#allocation5], %s320_s17 }
  0x5c   : > { %s3261_s1 = scalar_lea.hbm %s3667_s13, 3072  ;;  %s3266_s3 = scalar_lea.hbm %s4179_s0, 9216 }
  0x5d   : > { %p3262_p9 = scmp.ne.s32.totalorder %s3667_s13, %s3261_s1  ;;  %p3263_p12 = pneg %p3671_p10 }
  0x5e   : > { %p3268_p3 = scmp.lt.s32.totalorder %s3266_s3, %s3261_s1 }
  0x5f   : > { %p3264_p2 = pnand %p3263_p12, %p3262_p9 }
  0x61   : > { %p3265_p1 = pneg %p3264_p2 }
  0x63   : > { %p3270_p7 = pnand %p3268_p3, %p3265_p1 }
  0x65   : > { %3273 = shalt.err (!%p3270_p7)
}
  0x66   : > { %s3274_s5 = scalar_lea.vmem %s3675_s7, 3072  ;;  %s3456_s26 = smov [#allocation4]  }
  0x67   : > { %p3275_p0 = scmp.ne.s32.totalorder %s3675_s7, %s3274_s5  ;;  %s3279_s19 = sshll.u32 %s3456_s26, 4  ;;  %s3280_s19 = int_to_ptr.vmem [resolvable:$false] %s3279_s19 }
  0x68   : > { %s3281_s16 = scalar_lea.vmem %s3280_s19, 6144  ;;  %p3282_p6 = scmp.lt.s32.totalorder %s3675_s7, %s3280_s19 }
  0x69   : > { %p3277_p13 = pnand %p3275_p0, %p3263_p12  ;;  %p3283_p5 = scmp.lt.s32.totalorder %s3281_s16, %s3274_s5 }
  0x6b   : > { %p3278_p4 = pneg %p3277_p13  ;;  %p3284_p8 = por %p3283_p5, %p3282_p6 }
  0x6d   : > { %p3285_p9 = pnand %p3284_p8, %p3278_p4 }
  0x6f   : > { %3288 = shalt.err (!%p3285_p9)
}
  0x70   : > { %s3457_s17 = smov 192   ;;  %s3458_s22 = smov 12  }
  0x71   : > { %2928 = dma.hbm_to_vmem [thread:$0]  (!%p3671_p10), %s3667_s13, 3072, %s3675_s7, %s3677_s14, %s3457_s17, %s3457_s17, %s3458_s22  }
  0x72   : > { %348 = sbr.rel (%p3593_p11) target bundleno = 1194 (0x4aa), region = 48  ;;  %s350_s27 = sand.u32 (!%p3593_p11), 1, %s3423_s9  }
  0x73   : > { %s2896_s8 = smul.u32 (!%p3593_p11), 192, %s350_s27  ;;  %s351_s1 = scalar_lea.sflag (!%p3593_p11), [#allocation5], %s350_s27 }
  0x74   : > { %p4225_p12 = scmp.ne.s32.totalorder (!%p3593_p11), %s4212_s20, 0 }
  0x75   : > { %s3697_s2 = scalar_lea.vmem (!%p3593_p11), [#allocation4], %s2896_s8 }
  0x77   : > { %3386 = dma.done.wait (%p4225_p12), %s351_s1, 3072  }
  0x78   : > { %3388 = vsyncadd (%p4225_p12), %s351_s1, 4294964224  ;;  %p4226_p2 = scmp.ne.s32.totalorder %s4211_s18, 0 }
  0x7a   : > { %3390 = dma.done.wait (%p4226_p2), [#allocation8], 4096  }
  0x7b   : > { %3392 = vsyncadd (%p4226_p2), [#allocation8], 4294963200 }
  0x7c   : > { %3394 = dma.done.wait (%p4226_p2), [#allocation11], 2048  }
  0x7d   : > { %3396 = vsyncadd (%p4226_p2), [#allocation11], 4294965248  ;;  %s3712_s13 = sand.u32 1, %s3411_s28   ;;  %s2385_s20 = sshll.u32 %s3431_s11, 7 }
  0x7e   : > { %s2383_s23 = sshll.u32 %s3712_s13, 7  ;;  %s2384_s7 = sshll.u32 %s3712_s13, 8 }
  0x7f   : > { %s3717_s25 = scalar_lea.vmem [#allocation12], %s2383_s23  ;;  %s3719_s14 = scalar_lea.vmem [#allocation13], %s2384_s7 }
  0x80   : > { %p2386_p11 = scmp.ne.s32.totalorder %s3435_s12, 0 }
  0x81   : > { %s3724_s18 = sshra.s32 (!%p2386_p11), %s2385_s20, 3  ;;  %s4227_s19 = sld [smem:[#allocation26_spill]] (!%p2386_p11) }
  0x82   : > { %416 = sbr.rel (%p2386_p11) target bundleno = 635 (0x27b), region = 68  ;;  %s2461_s16 = sshll.u32 (!%p2386_p11), %s3724_s18, 2 }
  0x83   : > { %s2538_s4 = smul.u32 (!%p2386_p11), 12, %s3724_s18  ;;  %s1257_s17 = scalar_lea.vmem (!%p2386_p11), [#allocation3], %s2461_s16 }
  0x85   : > { %s3733_s3 = scalar_lea.vmem (!%p2386_p11), [#allocation2], %s2538_s4 }
  0x87   : > { %v3047_v0 = vld [vmem:[#allocation7 + $0x78] sm:$0xff]   ;;  %v3049_v2 = vld [vmem:[#allocation7 + $0x70] sm:$0xff]   ;;  %v3052_v5 = vld [vmem:[#allocation7 + $0x68] sm:$0xff]  }
  0x88   : > { %v3048_v1 = vld [vmem:[#allocation7 + $0x38] sm:$0xff]   ;;  %2606 = vmatprep.subr.bf16.mxu0 %v3047_v0  ;;  %v3051_v4 = vld [vmem:[#allocation7 + $0x30] sm:$0xff]   ;;  %v3054_v7 = vld [vmem:[#allocation7 + $0x28] sm:$0xff]  }
  0x89   : > { %2607 = vmatpush3.bf16.msra.mxu0 %v3048_v1  ;;  %v3050_v3 = vld [vmem:[#allocation7 + $0xb8] sm:$0xff]   ;;  %v3053_v6 = vld [vmem:[#allocation7 + $0xb0] sm:$0xff]   ;;  %v3055_v8 = vld [vmem:[#allocation7 + $0x60] sm:$0xff]  }
  0x8a   : > { %2608 = vmatprep.subr.bf16.mxu0 %v3049_v2  ;;  %2782 = vmatprep.subr.bf16.mxu1 %v3050_v3  ;;  %v3056_v9 = vld [vmem:[#allocation7 + $0xa8] sm:$0xff]   ;;  %v3057_v10 = vld [vmem:[#allocation7 + $0x20] sm:$0xff]   ;;  %v3058_v11 = vld [vmem:[#allocation7 + $0x58] sm:$0xff]  }
  0x8b   : > { %2783 = vmatpush3.bf16.msra.mxu1 %v3050_v3  ;;  %v3059_v12 = vld [vmem:[#allocation7 + $0xa0] sm:$0xff]   ;;  %v3060_v13 = vld [vmem:[#allocation7 + $0x18] sm:$0xff]   ;;  %v3061_v15 = vld [vmem:[#allocation7 + $0x50] sm:$0xff]  }
  0x8c   : > { %2784 = vmatprep.subr.bf16.mxu1 %v3053_v6  ;;  %v3062_v14 = vld [vmem:[#allocation7 + $0x98] sm:$0xff]   ;;  %v3063_v16 = vld [vmem:[#allocation7 + $0x10] sm:$0xff]   ;;  %v3064_v18 = vld [vmem:[#allocation7 + $0x48] sm:$0xff]  }
  0x8d   : > { %2609 = vmatpush3.bf16.msra.mxu0 %v3051_v4  ;;  %v3065_v17 = vld [vmem:[#allocation7 + $0x90] sm:$0xff]   ;;  %v3066_v19 = vld [vmem:[#allocation7 + $0x8] sm:$0xff]   ;;  %v3728_v21 = vld [vmem:[%s3697_s2] sm:$0xff] }
  0x8e   : > { %2610 = vmatprep.subr.bf16.mxu0 %v3052_v5  ;;  %v3068_v20 = vld [vmem:[#allocation7 + $0x88] sm:$0xff]   ;;  %v3067_v23 = vld [vmem:[#allocation7 + $0x40] sm:$0xff]   ;;  %454 = vst [vmem:[%s3733_s3] sm:$0xff] %v3728_v21  ;;  %v420_v28 = vld [vmem:[%s3697_s2 + $0x14] sm:$0xf] }
  0x8f   : > { %2785 = vmatpush3.bf16.msra.mxu1 %v3053_v6  ;;  %v3731_v22 = vld [vmem:[%s3697_s2 + $0xc] sm:$0xff]  ;;  %v418_v25 = vld [vmem:[%s3697_s2 + $0x8] sm:$0xf]  ;;  %v3069_v26 = vld [vmem:[#allocation7] sm:$0xff]   ;;  %457 = vst [vmem:[%s3733_s3 + $0x14] sm:$0xf] %v420_v28 }
  0x90   : > { %2786 = vmatprep.subr.bf16.mxu1 %v3056_v9  ;;  %456 = vst [vmem:[%s3733_s3 + $0xc] sm:$0xff] %v3731_v22  ;;  %v2390_v24 = vcombine.high %v3728_v21, %v3731_v22  ;;  %v3742_v27 = vld [vmem:[#allocation7 + $0x80] sm:$0xff]   ;;  %455 = vst [vmem:[%s3733_s3 + $0x8] sm:$0xf] %v418_v25  ;;  %v3750_v30 = vld [vmem:[%s3697_s2 + $0x2c] sm:$0xf]  ;;  %v2391_v31 = vcombine.low %v418_v25, %v420_v28  ;;  %v2389_v44 = vcombine.low %v3728_v21, %v3731_v22 }
  0x91   : > { %2611 = vmatpush3.bf16.msra.mxu0 %v3054_v7  ;;  %v3747_v29 = vld [vmem:[%s3697_s2 + $0x20] sm:$0xf]  ;;  %461 = vst [vmem:[%s3733_s3 + $0x2c] sm:$0xf] %v3750_v30  ;;  %v3758_v32 = vld [vmem:[%s3697_s2 + $0x18] sm:$0xff]  ;;  %v3761_v33 = vld [vmem:[%s3697_s2 + $0x24] sm:$0xff] }
  0x92   : > { %2612 = vmatprep.subr.bf16.mxu0 %v3055_v8  ;;  %845 = vmatprep.mubr.bf16.mxu0 %v2390_v24  ;;  %459 = vst [vmem:[%s3733_s3 + $0x20] sm:$0xf] %v3747_v29  ;;  %v3764_v34 = vld [vmem:[%s3697_s2 + $0x30] sm:$0xff]  ;;  %458 = vst [vmem:[%s3733_s3 + $0x18] sm:$0xff] %v3758_v32  ;;  %v3771_v35 = vld [vmem:[%s3697_s2 + $0x3c] sm:$0xff]  ;;  %v2393_v48 = vcombine.high %v3758_v32, %v3761_v33  ;;  %v2394_v55 = vcombine.low %v3747_v29, %v3750_v30 }
  0x93   : > { %2787 = vmatpush3.bf16.msra.mxu1 %v3056_v9  ;;  %460 = vst [vmem:[%s3733_s3 + $0x24] sm:$0xff] %v3761_v33  ;;  %462 = vst [vmem:[%s3733_s3 + $0x30] sm:$0xff] %v3764_v34  ;;  %v426_v36 = vld [vmem:[%s3697_s2 + $0x38] sm:$0xf]  ;;  %v428_v37 = vld [vmem:[%s3697_s2 + $0x44] sm:$0xf]  ;;  %2798 = vmatprep.mubr.bf16.mxu1 %v2391_v31  ;;  %v2392_v0 = vcombine.low %v3758_v32, %v3761_v33  ;;  %v2396_v1 = vcombine.high %v3764_v34, %v3771_v35 }
  0x94   : > { %2788 = vmatprep.subr.bf16.mxu1 %v3059_v12  ;;  %464 = vst [vmem:[%s3733_s3 + $0x3c] sm:$0xff] %v3771_v35  ;;  %463 = vst [vmem:[%s3733_s3 + $0x38] sm:$0xf] %v426_v36  ;;  %v3782_v38 = vld [vmem:[%s3697_s2 + $0x50] sm:$0xf]  ;;  %v3788_v40 = vld [vmem:[%s3697_s2 + $0x48] sm:$0xff]  ;;  %v2397_v59 = vcombine.low %v426_v36, %v428_v37  ;;  %v2395_v4 = vcombine.low %v3764_v34, %v3771_v35 }
  0x95   : > { %2613 = vmatpush3.bf16.msra.mxu0 %v3057_v10  ;;  %465 = vst [vmem:[%s3733_s3 + $0x44] sm:$0xf] %v428_v37  ;;  %v3785_v39 = vld [vmem:[%s3697_s2 + $0x5c] sm:$0xf]  ;;  %467 = vst [vmem:[%s3733_s3 + $0x50] sm:$0xf] %v3782_v38 }
  0x96   : > { %2614 = vmatprep.subr.bf16.mxu0 %v3058_v11  ;;  %469 = vst [vmem:[%s3733_s3 + $0x5c] sm:$0xf] %v3785_v39  ;;  %v3795_v41 = vld [vmem:[%s3697_s2 + $0x54] sm:$0xff]  ;;  %466 = vst [vmem:[%s3733_s3 + $0x48] sm:$0xff] %v3788_v40  ;;  %v3800_v42 = vld [vmem:[%s3697_s2 + $0x60] sm:$0xff]  ;;  %v2400_v2 = vcombine.low %v3782_v38, %v3785_v39 }
  0x97   : > { %2789 = vmatpush3.bf16.msra.mxu1 %v3059_v12  ;;  %v3803_v43 = vld [vmem:[%s3697_s2 + $0x6c] sm:$0xff]  ;;  %468 = vst [vmem:[%s3733_s3 + $0x54] sm:$0xff] %v3795_v41  ;;  %470 = vst [vmem:[%s3733_s3 + $0x60] sm:$0xff] %v3800_v42  ;;  %v434_v45 = vld [vmem:[%s3697_s2 + $0x68] sm:$0xf]  ;;  %v2399_v5 = vcombine.high %v3788_v40, %v3795_v41  ;;  %v2398_v8 = vcombine.low %v3788_v40, %v3795_v41 }
  0x98   : > { %2790 = vmatprep.subr.bf16.mxu1 %v3062_v14  ;;  %472 = vst [vmem:[%s3733_s3 + $0x6c] sm:$0xff] %v3803_v43  ;;  %v436_v46 = vld [vmem:[%s3697_s2 + $0x74] sm:$0xf]  ;;  %v438_v47 = vld [vmem:[%s3697_s2 + $0x80] sm:$0xf]  ;;  %v437_v50 = vld [vmem:[%s3697_s2 + $0x78] sm:$0xff]  ;;  %v2402_v9 = vcombine.high %v3800_v42, %v3803_v43  ;;  %v2401_v11 = vcombine.low %v3800_v42, %v3803_v43 }
  0x99   : > { %2615 = vmatpush3.bf16.msra.mxu0 %v3060_v13  ;;  %471 = vst [vmem:[%s3733_s3 + $0x68] sm:$0xf] %v434_v45  ;;  %473 = vst [vmem:[%s3733_s3 + $0x74] sm:$0xf] %v436_v46  ;;  %v440_v49 = vld [vmem:[%s3697_s2 + $0x8c] sm:$0xf]  ;;  %v2403_v3 = vcombine.low %v434_v45, %v436_v46 }
  0x9a   : > { %2616 = vmatprep.subr.bf16.mxu0 %v3061_v15  ;;  %475 = vst [vmem:[%s3733_s3 + $0x80] sm:$0xf] %v438_v47  ;;  %v439_v51 = vld [vmem:[%s3697_s2 + $0x84] sm:$0xff]  ;;  %477 = vst [vmem:[%s3733_s3 + $0x8c] sm:$0xf] %v440_v49  ;;  %v441_v52 = vld [vmem:[%s3697_s2 + $0x90] sm:$0xff]  ;;  %v2406_v6 = vcombine.low %v438_v47, %v440_v49 }
  0x9b   : > { %2791 = vmatpush3.bf16.msra.mxu1 %v3062_v14  ;;  %474 = vst [vmem:[%s3733_s3 + $0x78] sm:$0xff] %v437_v50  ;;  %476 = vst [vmem:[%s3733_s3 + $0x84] sm:$0xff] %v439_v51  ;;  %v443_v53 = vld [vmem:[%s3697_s2 + $0x9c] sm:$0xff]  ;;  %v442_v54 = vld [vmem:[%s3697_s2 + $0x98] sm:$0xf]  ;;  %v2405_v12 = vcombine.high %v437_v50, %v439_v51  ;;  %v2404_v13 = vcombine.low %v437_v50, %v439_v51 }
  0x9c   : > { %2792 = vmatprep.subr.bf16.mxu1 %v3065_v17  ;;  %478 = vst [vmem:[%s3733_s3 + $0x90] sm:$0xff] %v441_v52  ;;  %480 = vst [vmem:[%s3733_s3 + $0x9c] sm:$0xff] %v443_v53  ;;  %v444_v56 = vld [vmem:[%s3697_s2 + $0xa4] sm:$0xf]  ;;  %v446_v57 = vld [vmem:[%s3697_s2 + $0xb0] sm:$0xf]  ;;  %v2408_v14 = vcombine.high %v441_v52, %v443_v53  ;;  %v2407_v15 = vcombine.low %v441_v52, %v443_v53 }
  0x9d   : > { %2617 = vmatpush3.bf16.msra.mxu0 %v3063_v16  ;;  %479 = vst [vmem:[%s3733_s3 + $0x98] sm:$0xf] %v442_v54  ;;  %v448_v58 = vld [vmem:[%s3697_s2 + $0xbc] sm:$0xf]  ;;  %481 = vst [vmem:[%s3733_s3 + $0xa4] sm:$0xf] %v444_v56  ;;  %v2409_v7 = vcombine.low %v442_v54, %v444_v56 }
  0x9e   : > { %2618 = vmatprep.subr.bf16.mxu0 %v3064_v18  ;;  %483 = vst [vmem:[%s3733_s3 + $0xb0] sm:$0xf] %v446_v57  ;;  %485 = vst [vmem:[%s3733_s3 + $0xbc] sm:$0xf] %v448_v58  ;;  %v445_v60 = vld [vmem:[%s3697_s2 + $0xa8] sm:$0xff]  ;;  %v447_v61 = vld [vmem:[%s3697_s2 + $0xb4] sm:$0xff]  ;;  %v2412_v10 = vcombine.low %v446_v57, %v448_v58 }
  0x9f   : > { %2793 = vmatpush3.bf16.msra.mxu1 %v3065_v17  ;;  %482 = vst [vmem:[%s3733_s3 + $0xa8] sm:$0xff] %v445_v60  ;;  %484 = vst [vmem:[%s3733_s3 + $0xb4] sm:$0xff] %v447_v61  ;;  %v3095_v62 = vld [vmem:[#allocation9 + $0x38] sm:$0xff]   ;;  %v3096_v63 = vld [vmem:[#allocation9 + $0x30] sm:$0xff]   ;;  %v2411_v16 = vcombine.high %v445_v60, %v447_v61  ;;  %v2410_v17 = vcombine.low %v445_v60, %v447_v61 }
  0xa0   : > { %2794 = vmatprep.subr.bf16.mxu1 %v3068_v20  ;;  %v3097_v18 = vld [vmem:[#allocation9 + $0x28] sm:$0xff]   ;;  %v3100_v21 = vld [vmem:[#allocation9 + $0x10] sm:$0xff]  }
  0xa1   : > { %2619 = vmatpush3.bf16.msra.mxu0 %v3066_v19  ;;  %v3098_v19 = vld [vmem:[#allocation9 + $0x20] sm:$0xff]   ;;  %v3101_v22 = vld [vmem:[#allocation9 + $0x8] sm:$0xff]  }
  0xa2   : > { %2620 = vmatprep.subr.bf16.mxu0 %v3067_v23  ;;  %v3102_v23 = vld [vmem:[#allocation9] sm:$0xff]  }
  0xa3   : > { %2795 = vmatpush3.bf16.msra.mxu1 %v3068_v20  ;;  %v3099_v20 = vld [vmem:[#allocation9 + $0x18] sm:$0xff]  }
  0xa4   : > { %2796 = vmatprep.subr.bf16.mxu1 %v3742_v27 }
  0xa5   : > { %2621 = vmatpush3.bf16.msra.mxu0 %v3069_v26  ;;  %v3866_v26 = vld [vmem:[%s4227_s19] ss:$0 sm:$0xff] }
  0xa7   : > { %2797 = vmatpush3.bf16.msra.mxu1 %v3742_v27 }
  0xa8   : > { %846 = vmatmul.mubr.bf16.vlgmr.msra.gmra.mxu0 %v2389_v44  ;;  %2814 = vmatprep.subr.bf16.mxu1 %v3095_v62 }
  0xa9   : > { %853 = vmatprep.mubr.bf16.mxu0 %v2393_v48 }
  0xaa   : > { %2799 = vmatmul.mubr.bf16.vlgmr.msra.gmra.mxu1 %v2394_v55 }
  0xab   : > { %2802 = vmatprep.mubr.bf16.mxu1 %v2397_v59  ;;  %2815 = vmatpush3.bf16.msra.mxu1 %v3095_v62 }
  0xac   : > { %2816 = vmatprep.subr.bf16.mxu1 %v3096_v63 }
  0xaf   : > { %2817 = vmatpush3.bf16.msra.mxu1 %v3096_v63 }
  0xb0   : > { %854 = vmatmul.mubr.bf16.gmra.mxu0 %v2392_v0  ;;  %2818 = vmatprep.subr.bf16.mxu1 %v3097_v18 }
  0xb1   : > { %861 = vmatprep.mubr.bf16.mxu0 %v2396_v1 }
  0xb2   : > { %2803 = vmatmul.mubr.bf16.gmra.mxu1 %v2400_v2 }
  0xb3   : > { %2806 = vmatprep.mubr.bf16.mxu1 %v2403_v3  ;;  %2819 = vmatpush3.bf16.msra.mxu1 %v3097_v18 }
  0xb4   : > { %2820 = vmatprep.subr.bf16.mxu1 %v3098_v19 }
  0xb7   : > { %2821 = vmatpush3.bf16.msra.mxu1 %v3098_v19 }
  0xb8   : > { %862 = vmatmul.mubr.bf16.gmra.mxu0 %v2395_v4  ;;  %2822 = vmatprep.subr.bf16.mxu1 %v3099_v20 }
  0xb9   : > { %869 = vmatprep.mubr.bf16.mxu0 %v2399_v5 }
  0xba   : > { %2807 = vmatmul.mubr.bf16.gmra.mxu1 %v2406_v6 }
  0xbb   : > { %2810 = vmatprep.mubr.bf16.mxu1 %v2409_v7  ;;  %2823 = vmatpush3.bf16.msra.mxu1 %v3099_v20 }
  0xbc   : > { %2824 = vmatprep.subr.bf16.mxu1 %v3100_v21 }
  0xbf   : > { %2825 = vmatpush3.bf16.msra.mxu1 %v3100_v21 }
  0xc0   : > { %870 = vmatmul.mubr.bf16.gmra.mxu0 %v2398_v8  ;;  %2826 = vmatprep.subr.bf16.mxu1 %v3101_v22 }
  0xc1   : > { %877 = vmatprep.mubr.bf16.mxu0 %v2402_v9 }
  0xc2   : > { %2811 = vmatmul.mubr.bf16.gmra.mxu1 %v2412_v10 }
  0xc3   : > { %2827 = vmatpush3.bf16.msra.mxu1 %v3101_v22 }
  0xc4   : > { %2828 = vmatprep.subr.bf16.mxu1 %v3102_v23 }
  0xc7   : > { %2829 = vmatpush3.bf16.msra.mxu1 %v3102_v23 }
  0xc8   : > { %878 = vmatmul.mubr.bf16.gmra.mxu0 %v2401_v11 }
  0xc9   : > { %885 = vmatprep.mubr.bf16.mxu0 %v2405_v12 }
  0xd0   : > { %886 = vmatmul.mubr.bf16.gmra.mxu0 %v2404_v13 }
  0xd1   : > { %893 = vmatprep.mubr.bf16.mxu0 %v2408_v14 }
  0xd8   : > { %894 = vmatmul.mubr.bf16.gmra.mxu0 %v2407_v15 }
  0xd9   : > { %901 = vmatprep.mubr.bf16.mxu0 %v2411_v16 }
  0xe0   : > { %902 = vmatmul.mubr.bf16.gmra.mxu0 %v2410_v17 }
 0x168   : > { %v2622_v24 = vpop.f32.mrf.mxu0 }
 0x16a   : > { %v2623_v25 = vpop.f32.mrf.mxu0  ;;  %v2800_v28 = vpop.f32.mrf.mxu1 }
 0x16b   : > { %v2624_v27 = vadd.f32 %v2623_v25, %v2622_v24 }
 0x16c   : > { %v2625_v29 = vpop.f32.mrf.mxu0  ;;  %v944_v31 = vpop.f32.mrf.mxu1 }
 0x16d   : > { %v848_v30 = vadd.f32 %v2624_v27, %v3866_v26 }
 0x16e   : > { %v2626_v32 = vpop.f32.mrf.mxu0  ;;  %v2801_v34 = vpop.f32.mrf.mxu1 }
 0x16f   : > { %v2627_v33 = vadd.f32 %v2626_v32, %v2625_v29  ;;  %v945_v36 = vadd.f32 %v944_v31, %v848_v30 }
 0x170   : > { %v2628_v35 = vpop.f32.mrf.mxu0  ;;  %v947_v38 = vpop.f32.mrf.mxu1 }
 0x171   : > { %v851_v37 = vadd.f32 %v2627_v33, %v3866_v26  ;;  %v1007_v44 = vmax.f32 %v945_v36, 0.0 }
 0x172   : > { %v2629_v39 = vpop.f32.mrf.mxu0  ;;  %v2804_v43 = vpop.f32.mrf.mxu1 }
 0x173   : > { %v2630_v40 = vadd.f32 %v2629_v39, %v2628_v35  ;;  %v948_v41 = vadd.f32 %v947_v38, %v851_v37 }
 0x174   : > { %v2631_v42 = vpop.f32.mrf.mxu0  ;;  %v960_v51 = vpop.f32.mrf.mxu1 }
 0x175   : > { %v856_v45 = vadd.f32 %v2630_v40, %v3866_v26  ;;  %v1008_v46 = vmax.f32 %v948_v41, 0.0 }
 0x176   : > { %v2632_v47 = vpop.f32.mrf.mxu0  ;;  %v2805_v58 = vpop.f32.mrf.mxu1 }
 0x177   : > { %v1023_v48 = vpack.c.bf16 %v1008_v46, %v1007_v44  ;;  %v2633_v49 = vadd.f32 %v2632_v47, %v2631_v42  ;;  %v953_v52 = vadd.f32 %v2800_v28, %v856_v45 }
 0x178   : > { %v2634_v50 = vpop.f32.mrf.mxu0  ;;  %v963_v2 = vpop.f32.mrf.mxu1 }
 0x179   : > { %v859_v53 = vadd.f32 %v2633_v49, %v3866_v26  ;;  %2830 = vmatprep.mubr.bf16.mxu1 %v1023_v48  ;;  %v1009_v59 = vmax.f32 %v953_v52, 0.0 }
 0x17a   : > { %v2635_v54 = vpop.f32.mrf.mxu0  ;;  %v2808_v9 = vpop.f32.mrf.mxu1 }
 0x17b   : > { %v956_v55 = vadd.f32 %v2801_v34, %v859_v53  ;;  %v2636_v56 = vadd.f32 %v2635_v54, %v2634_v50 }
 0x17c   : > { %v2637_v57 = vpop.f32.mrf.mxu0  ;;  %v976_v17 = vpop.f32.mrf.mxu1 }
 0x17d   : > { %v1010_v60 = vmax.f32 %v956_v55, 0.0  ;;  %v864_v61 = vadd.f32 %v2636_v56, %v3866_v26 }
 0x17e   : > { %v2638_v62 = vpop.f32.mrf.mxu0  ;;  %v2809_v24 = vpop.f32.mrf.mxu1 }
 0x17f   : > { %v1024_v63 = vpack.c.bf16 %v1010_v60, %v1009_v59  ;;  %v2639_v0 = vadd.f32 %v2638_v62, %v2637_v57  ;;  %v961_v3 = vadd.f32 %v960_v51, %v864_v61 }
 0x180   : > { %v2640_v1 = vpop.f32.mrf.mxu0  ;;  %v979_v33 = vpop.f32.mrf.mxu1 }
 0x181   : > { %2831 = vmatmul.mubr.bf16.vlgmr.msra.gmra.mxu1 %v1024_v63  ;;  %v867_v4 = vadd.f32 %v2639_v0, %v3866_v26  ;;  %v1011_v10 = vmax.f32 %v961_v3, 0.0 }
 0x182   : > { %v2641_v5 = vpop.f32.mrf.mxu0  ;;  %v2812_v40 = vpop.f32.mrf.mxu1 }
 0x183   : > { %v2642_v6 = vadd.f32 %v2641_v5, %v2640_v1  ;;  %v964_v7 = vadd.f32 %v963_v2, %v867_v4 }
 0x184   : > { %v2643_v8 = vpop.f32.mrf.mxu0  ;;  %v992_v48 = vpop.f32.mrf.mxu1 }
 0x185   : > { %v872_v11 = vadd.f32 %v2642_v6, %v3866_v26  ;;  %v1012_v12 = vmax.f32 %v964_v7, 0.0 }
 0x186   : > { %v2644_v13 = vpop.f32.mrf.mxu0  ;;  %v2813_v55 = vpop.f32.mrf.mxu1 }
 0x187   : > { %v1025_v14 = vpack.c.bf16 %v1012_v12, %v1011_v10  ;;  %v2645_v15 = vadd.f32 %v2644_v13, %v2643_v8  ;;  %v969_v18 = vadd.f32 %v2804_v43, %v872_v11 }
 0x188   : > { %v2646_v16 = vpop.f32.mrf.mxu0  ;;  %v995_v63 = vpop.f32.mrf.mxu1 }
 0x189   : > { %v875_v19 = vadd.f32 %v2645_v15, %v3866_v26  ;;  %2834 = vmatprep.mubr.bf16.mxu1 %v1025_v14  ;;  %v1013_v25 = vmax.f32 %v969_v18, 0.0  ;;  %v3459_v18 = vmov 0.0  }
 0x18a   : > { %v2647_v20 = vpop.f32.mrf.mxu0  ;;  %1274 = vst [vmem:[%s3717_s25] sm:$0xff] %v3459_v18  ;;  %1275 = vst [vmem:[%s3717_s25 + $0x8] sm:$0xff] %v3459_v18 }
 0x18b   : > { %v972_v21 = vadd.f32 %v2805_v58, %v875_v19  ;;  %v2648_v22 = vadd.f32 %v2647_v20, %v2646_v16  ;;  %1276 = vst [vmem:[%s3717_s25 + $0x10] sm:$0xff] %v3459_v18  ;;  %1277 = vst [vmem:[%s3717_s25 + $0x18] sm:$0xff] %v3459_v18 }
 0x18c   : > { %v2649_v23 = vpop.f32.mrf.mxu0  ;;  %1278 = vst [vmem:[%s3717_s25 + $0x20] sm:$0xff] %v3459_v18  ;;  %1279 = vst [vmem:[%s3717_s25 + $0x28] sm:$0xff] %v3459_v18 }
 0x18d   : > { %v1014_v27 = vmax.f32 %v972_v21, 0.0  ;;  %v880_v28 = vadd.f32 %v2648_v22, %v3866_v26  ;;  %1280 = vst [vmem:[%s3717_s25 + $0x30] sm:$0xff] %v3459_v18  ;;  %1281 = vst [vmem:[%s3717_s25 + $0x38] sm:$0xff] %v3459_v18 }
 0x18e   : > { %v2650_v29 = vpop.f32.mrf.mxu0  ;;  %1282 = vst [vmem:[%s3717_s25 + $0x40] sm:$0xff] %v3459_v18  ;;  %1283 = vst [vmem:[%s3717_s25 + $0x48] sm:$0xff] %v3459_v18 }
 0x18f   : > { %v2651_v30 = vadd.f32 %v2650_v29, %v2649_v23  ;;  %v1026_v31 = vpack.c.bf16 %v1014_v27, %v1013_v25  ;;  %v977_v34 = vadd.f32 %v976_v17, %v880_v28  ;;  %1284 = vst [vmem:[%s3717_s25 + $0x50] sm:$0xff] %v3459_v18  ;;  %1285 = vst [vmem:[%s3717_s25 + $0x58] sm:$0xff] %v3459_v18 }
 0x190   : > { %v2652_v32 = vpop.f32.mrf.mxu0  ;;  %1286 = vst [vmem:[%s3717_s25 + $0x60] sm:$0xff] %v3459_v18  ;;  %1287 = vst [vmem:[%s3717_s25 + $0x68] sm:$0xff] %v3459_v18 }
 0x191   : > { %2835 = vmatmul.mubr.bf16.gmra.mxu1 %v1026_v31  ;;  %v883_v35 = vadd.f32 %v2651_v30, %v3866_v26  ;;  %v1015_v41 = vmax.f32 %v977_v34, 0.0  ;;  %1288 = vst [vmem:[%s3717_s25 + $0x70] sm:$0xff] %v3459_v18  ;;  %1289 = vst [vmem:[%s3717_s25 + $0x78] sm:$0xff] %v3459_v18 }
 0x192   : > { %v2653_v36 = vpop.f32.mrf.mxu0  ;;  %1290 = vst [vmem:[%s3719_s14] sm:$0xff] %v3459_v18  ;;  %1291 = vst [vmem:[%s3719_s14 + $0x8] sm:$0xff] %v3459_v18 }
 0x193   : > { %v2654_v37 = vadd.f32 %v2653_v36, %v2652_v32  ;;  %v980_v38 = vadd.f32 %v979_v33, %v883_v35  ;;  %1292 = vst [vmem:[%s3719_s14 + $0x10] sm:$0xff] %v3459_v18  ;;  %1293 = vst [vmem:[%s3719_s14 + $0x18] sm:$0xff] %v3459_v18 }
 0x194   : > { %v2655_v39 = vpop.f32.mrf.mxu0  ;;  %1294 = vst [vmem:[%s3719_s14 + $0x20] sm:$0xff] %v3459_v18  ;;  %1295 = vst [vmem:[%s3719_s14 + $0x28] sm:$0xff] %v3459_v18 }
 0x195   : > { %v888_v42 = vadd.f32 %v2654_v37, %v3866_v26  ;;  %v1016_v43 = vmax.f32 %v980_v38, 0.0  ;;  %1296 = vst [vmem:[%s3719_s14 + $0x30] sm:$0xff] %v3459_v18  ;;  %1297 = vst [vmem:[%s3719_s14 + $0x38] sm:$0xff] %v3459_v18 }
 0x196   : > { %v2656_v44 = vpop.f32.mrf.mxu0  ;;  %1298 = vst [vmem:[%s3719_s14 + $0x40] sm:$0xff] %v3459_v18  ;;  %1299 = vst [vmem:[%s3719_s14 + $0x48] sm:$0xff] %v3459_v18 }
 0x197   : > { %v1027_v45 = vpack.c.bf16 %v1016_v43, %v1015_v41  ;;  %v2657_v46 = vadd.f32 %v2656_v44, %v2655_v39  ;;  %v985_v49 = vadd.f32 %v2808_v9, %v888_v42  ;;  %1300 = vst [vmem:[%s3719_s14 + $0x50] sm:$0xff] %v3459_v18  ;;  %1301 = vst [vmem:[%s3719_s14 + $0x58] sm:$0xff] %v3459_v18 }
 0x198   : > { %v2658_v47 = vpop.f32.mrf.mxu0  ;;  %1302 = vst [vmem:[%s3719_s14 + $0x60] sm:$0xff] %v3459_v18  ;;  %1303 = vst [vmem:[%s3719_s14 + $0x68] sm:$0xff] %v3459_v18 }
 0x199   : > { %v891_v50 = vadd.f32 %v2657_v46, %v3866_v26  ;;  %2838 = vmatprep.mubr.bf16.mxu1 %v1027_v45  ;;  %v1017_v56 = vmax.f32 %v985_v49, 0.0  ;;  %1304 = vst [vmem:[%s3719_s14 + $0x70] sm:$0xff] %v3459_v18  ;;  %1305 = vst [vmem:[%s3719_s14 + $0x78] sm:$0xff] %v3459_v18 }
 0x19a   : > { %v2659_v51 = vpop.f32.mrf.mxu0  ;;  %1306 = vst [vmem:[%s3719_s14 + $0x80] sm:$0xff] %v3459_v18  ;;  %1307 = vst [vmem:[%s3719_s14 + $0x88] sm:$0xff] %v3459_v18 }
 0x19b   : > { %v988_v52 = vadd.f32 %v2809_v24, %v891_v50  ;;  %v2660_v53 = vadd.f32 %v2659_v51, %v2658_v47  ;;  %1308 = vst [vmem:[%s3719_s14 + $0x90] sm:$0xff] %v3459_v18  ;;  %1309 = vst [vmem:[%s3719_s14 + $0x98] sm:$0xff] %v3459_v18 }
 0x19c   : > { %v2661_v54 = vpop.f32.mrf.mxu0  ;;  %1310 = vst [vmem:[%s3719_s14 + $0xa0] sm:$0xff] %v3459_v18  ;;  %1311 = vst [vmem:[%s3719_s14 + $0xa8] sm:$0xff] %v3459_v18 }
 0x19d   : > { %v1018_v57 = vmax.f32 %v988_v52, 0.0  ;;  %v896_v58 = vadd.f32 %v2660_v53, %v3866_v26  ;;  %1312 = vst [vmem:[%s3719_s14 + $0xb0] sm:$0xff] %v3459_v18  ;;  %1313 = vst [vmem:[%s3719_s14 + $0xb8] sm:$0xff] %v3459_v18 }
 0x19e   : > { %v2662_v59 = vpop.f32.mrf.mxu0  ;;  %1314 = vst [vmem:[%s3719_s14 + $0xc0] sm:$0xff] %v3459_v18  ;;  %1315 = vst [vmem:[%s3719_s14 + $0xc8] sm:$0xff] %v3459_v18 }
 0x19f   : > { %v2663_v60 = vadd.f32 %v2662_v59, %v2661_v54  ;;  %v1028_v61 = vpack.c.bf16 %v1018_v57, %v1017_v56  ;;  %v993_v0 = vadd.f32 %v992_v48, %v896_v58  ;;  %1316 = vst [vmem:[%s3719_s14 + $0xd0] sm:$0xff] %v3459_v18  ;;  %1317 = vst [vmem:[%s3719_s14 + $0xd8] sm:$0xff] %v3459_v18 }
 0x1a0   : > { %v2664_v62 = vpop.f32.mrf.mxu0  ;;  %1318 = vst [vmem:[%s3719_s14 + $0xe0] sm:$0xff] %v3459_v18  ;;  %1319 = vst [vmem:[%s3719_s14 + $0xe8] sm:$0xff] %v3459_v18 }
 0x1a1   : > { %2839 = vmatmul.mubr.bf16.gmra.mxu1 %v1028_v61  ;;  %v899_v1 = vadd.f32 %v2663_v60, %v3866_v26  ;;  %v1019_v6 = vmax.f32 %v993_v0, 0.0  ;;  %1320 = vst [vmem:[%s3719_s14 + $0xf0] sm:$0xff] %v3459_v18  ;;  %1321 = vst [vmem:[%s3719_s14 + $0xf8] sm:$0xff] %v3459_v18 }
 0x1a2   : > { %v2665_v2 = vpop.f32.mrf.mxu0 }
 0x1a3   : > { %v2666_v3 = vadd.f32 %v2665_v2, %v2664_v62  ;;  %v996_v4 = vadd.f32 %v995_v63, %v899_v1 }
 0x1a4   : > { %v2667_v5 = vpop.f32.mrf.mxu0 }
 0x1a5   : > { %v904_v7 = vadd.f32 %v2666_v3, %v3866_v26  ;;  %v1020_v8 = vmax.f32 %v996_v4, 0.0 }
 0x1a6   : > { %v2668_v9 = vpop.f32.mrf.mxu0 }
 0x1a7   : > { %v1029_v10 = vpack.c.bf16 %v1020_v8, %v1019_v6  ;;  %v2669_v11 = vadd.f32 %v2668_v9, %v2667_v5  ;;  %v1001_v12 = vadd.f32 %v2812_v40, %v904_v7 }
 0x1a9   : > { %v907_v13 = vadd.f32 %v2669_v11, %v3866_v26  ;;  %2842 = vmatprep.mubr.bf16.mxu1 %v1029_v10  ;;  %v1021_v15 = vmax.f32 %v1001_v12, 0.0 }
 0x1ab   : > { %v1004_v14 = vadd.f32 %v2813_v55, %v907_v13 }
 0x1ad   : > { %v1022_v16 = vmax.f32 %v1004_v14, 0.0 }
 0x1af   : > { %v1030_v17 = vpack.c.bf16 %v1022_v16, %v1021_v15 }
 0x1b1   : > { %2843 = vmatmul.mubr.bf16.gmra.mxu1 %v1030_v17 }
 0x241   : > { %v2832_v26 = vpop.f32.mrf.mxu1 }
 0x243   : > { %v1129_v19 = vpop.f32.mrf.mxu1 }
 0x245   : > { %v2833_v20 = vpop.f32.mrf.mxu1 }
 0x246   : > { %v2567_v21 = vpack.c.bf16 %v2833_v20, %v2832_v26 }
 0x247   : > { %v1132_v22 = vpop.f32.mrf.mxu1 }
 0x248   : > { %2599 = vst [vmem:[%s1257_s17 + $0x8] sm:$0xff] %v2567_v21   ;;  %v2562_v23 = vpack.c.bf16 %v1132_v22, %v1129_v19 }
 0x24a   : > { %2563 = vst [vmem:[%s1257_s17] sm:$0xff] %v2562_v23  }
 0x251   : > { %v2836_v24 = vpop.f32.mrf.mxu1 }
 0x253   : > { %v1145_v25 = vpop.f32.mrf.mxu1 }
 0x255   : > { %v2837_v27 = vpop.f32.mrf.mxu1 }
 0x256   : > { %v2577_v28 = vpack.c.bf16 %v2837_v27, %v2836_v24 }
 0x257   : > { %v1148_v29 = vpop.f32.mrf.mxu1 }
 0x258   : > { %2601 = vst [vmem:[%s1257_s17 + $0x18] sm:$0xff] %v2577_v28   ;;  %v2572_v30 = vpack.c.bf16 %v1148_v29, %v1145_v25 }
 0x25a   : > { %2600 = vst [vmem:[%s1257_s17 + $0x10] sm:$0xff] %v2572_v30  }
 0x261   : > { %v2840_v31 = vpop.f32.mrf.mxu1 }
 0x263   : > { %v1161_v32 = vpop.f32.mrf.mxu1 }
 0x265   : > { %v2841_v33 = vpop.f32.mrf.mxu1 }
 0x266   : > { %v2587_v34 = vpack.c.bf16 %v2841_v33, %v2840_v31 }
 0x267   : > { %v1164_v35 = vpop.f32.mrf.mxu1 }
 0x268   : > { %2603 = vst [vmem:[%s1257_s17 + $0x28] sm:$0xff] %v2587_v34   ;;  %v2582_v36 = vpack.c.bf16 %v1164_v35, %v1161_v32 }
 0x26a   : > { %2602 = vst [vmem:[%s1257_s17 + $0x20] sm:$0xff] %v2582_v36  }
 0x271   : > { %v2844_v37 = vpop.f32.mrf.mxu1 }
 0x273   : > { %v1177_v38 = vpop.f32.mrf.mxu1 }
 0x275   : > { %v2845_v39 = vpop.f32.mrf.mxu1 }
 0x276   : > { %v2597_v40 = vpack.c.bf16 %v2845_v39, %v2844_v37 }
 0x277   : > { %v1180_v41 = vpop.f32.mrf.mxu1 }
 0x278   : > { %2605 = vst [vmem:[%s1257_s17 + $0x38] sm:$0xff] %v2597_v40   ;;  %v2592_v42 = vpack.c.bf16 %v1180_v41, %v1177_v38 }
 0x27a   : > { %2604 = vst [vmem:[%s1257_s17 + $0x30] sm:$0xff] %v2592_v42  }
 0x27b PF: > { %p2462_p10 = scmp.ne.s32.totalorder %s3435_s12, 1 }
 0x27c   : > { %s1326_s12 = sshra.s32 (!%p2462_p10), %s2385_s20, 3  ;;  %s4228_s2 = sld [smem:[#allocation28_spill]] (!%p2462_p10) }
 0x27d   : > { %1325 = sbr.rel (%p2462_p10) target bundleno = 1142 (0x476), region = 72  ;;  %s4229_s7 = sld [smem:[#allocation30_spill]] (!%p2462_p10) }
 0x27e   : > { %s2555_s22 = smul.u32 (!%p2462_p10), 12, %s1326_s12 }
 0x280   : > { %s3936_s27 = scalar_lea.vmem (!%p2462_p10), [#allocation2], %s2555_s22 }
 0x282   : > { %v3103_v43 = vld [vmem:[#allocation3 + $0x78] sm:$0xff]   ;;  %v3105_v45 = vld [vmem:[#allocation3 + $0x70] sm:$0xff]   ;;  %v3108_v48 = vld [vmem:[#allocation3 + $0x68] sm:$0xff]  }
 0x283   : > { %v3104_v44 = vld [vmem:[#allocation3 + $0x38] sm:$0xff]   ;;  %2702 = vmatprep.subr.bf16.mxu0 %v3103_v43  ;;  %v3107_v47 = vld [vmem:[#allocation3 + $0x30] sm:$0xff]   ;;  %v3110_v50 = vld [vmem:[#allocation3 + $0x28] sm:$0xff]   ;;  %v3460_v43 = vmov 0  }
 0x284   : > { %2703 = vmatpush3.bf16.msra.mxu0 %v3104_v44  ;;  %v3106_v46 = vld [vmem:[#allocation3 + $0xb8] sm:$0xff]   ;;  %v3109_v49 = vld [vmem:[#allocation3 + $0xb0] sm:$0xff]   ;;  %v3111_v51 = vld [vmem:[#allocation3 + $0x60] sm:$0xff]  }
 0x285   : > { %2704 = vmatprep.subr.bf16.mxu0 %v3105_v45  ;;  %2846 = vmatprep.subr.bf16.mxu1 %v3106_v46  ;;  %v3112_v52 = vld [vmem:[#allocation3 + $0xa8] sm:$0xff]   ;;  %v3113_v53 = vld [vmem:[#allocation3 + $0x20] sm:$0xff]   ;;  %v3114_v54 = vld [vmem:[#allocation3 + $0x58] sm:$0xff]  }
 0x286   : > { %2847 = vmatpush3.bf16.msra.mxu1 %v3106_v46  ;;  %v3115_v55 = vld [vmem:[#allocation3 + $0xa0] sm:$0xff]   ;;  %v3116_v56 = vld [vmem:[#allocation3 + $0x18] sm:$0xff]   ;;  %v3117_v58 = vld [vmem:[#allocation3 + $0x50] sm:$0xff]  }
 0x287   : > { %2848 = vmatprep.subr.bf16.mxu1 %v3109_v49  ;;  %v3118_v57 = vld [vmem:[#allocation3 + $0x98] sm:$0xff]   ;;  %v3119_v59 = vld [vmem:[#allocation3 + $0x10] sm:$0xff]   ;;  %v3120_v61 = vld [vmem:[#allocation3 + $0x48] sm:$0xff]  }
 0x288   : > { %2705 = vmatpush3.bf16.msra.mxu0 %v3107_v47  ;;  %v3121_v60 = vld [vmem:[#allocation3 + $0x90] sm:$0xff]   ;;  %v3122_v62 = vld [vmem:[#allocation3 + $0x8] sm:$0xff]   ;;  %v3123_v63 = vld [vmem:[#allocation3 + $0x40] sm:$0xff]  }
 0x289   : > { %2706 = vmatprep.subr.bf16.mxu0 %v3108_v48  ;;  %v3124_v0 = vld [vmem:[#allocation3 + $0x88] sm:$0xff]   ;;  %v3128_v1 = vld [vmem:[%s3936_s27 + $0x4] ss:$12 sps:$4 sm:$0xff]   ;;  %v3137_v10 = vld [vmem:[%s3936_s27 + $0x34] ss:$12 sps:$4 sm:$0xff]  }
 0x28a   : > { %2849 = vmatpush3.bf16.msra.mxu1 %v3109_v49  ;;  %v3125_v2 = vld [vmem:[#allocation3] sm:$0xff]   ;;  %1722 = vmatprep.mubr.bf16.mxu0 %v3128_v1  ;;  %v3130_v3 = vld [vmem:[%s3936_s27 + $0x8] ss:$12 sps:$4 sm:$0xff]   ;;  %v3136_v11 = vld [vmem:[%s3936_s27 + $0x50] ss:$12 sps:$4 sm:$0xff]  }
 0x28b   : > { %2850 = vmatprep.subr.bf16.mxu1 %v3112_v52  ;;  %v3129_v4 = vld [vmem:[#allocation3 + $0x80] sm:$0xff]   ;;  %2862 = vmatprep.mubr.bf16.mxu1 %v3130_v3  ;;  %v3132_v6 = vld [vmem:[%s3936_s27 + $0x1c] ss:$12 sps:$4 sm:$0xff]   ;;  %v3159_v13 = vld [vmem:[#allocation10 + $0x70] ss:$8 sps:$4 sm:$0xff]  }
 0x28c   : > { %2707 = vmatpush3.bf16.msra.mxu0 %v3110_v50  ;;  %v3126_v5 = vld [vmem:[%s3936_s27] ss:$12 sps:$4 sm:$0xff]   ;;  %v3135_v8 = vld [vmem:[%s3936_s27 + $0x38] ss:$12 sps:$4 sm:$0xff]   ;;  %v3143_v12 = vld [vmem:[%s3936_s27 + $0x68] ss:$12 sps:$4 sm:$0xff]  }
 0x28d   : > { %2708 = vmatprep.subr.bf16.mxu0 %v3111_v51  ;;  %v3131_v7 = vld [vmem:[%s3936_s27 + $0x20] ss:$12 sps:$4 sm:$0xff]   ;;  %v3134_v9 = vld [vmem:[%s3936_s27 + $0x18] ss:$12 sps:$4 sm:$0xff]   ;;  %v3161_v14 = vld [vmem:[#allocation10 + $0x74] ss:$8 sps:$4 sm:$0xff]  }
 0x28e   : > { %2851 = vmatpush3.bf16.msra.mxu1 %v3112_v52  ;;  %v3164_v15 = vld [vmem:[#allocation10 + $0x64] ss:$8 sps:$4 sm:$0xff]   ;;  %v3139_v16 = vld [vmem:[%s3936_s27 + $0x30] ss:$12 sps:$4 sm:$0xff]   ;;  %v3162_v26 = vld [vmem:[#allocation10 + $0x60] ss:$8 sps:$4 sm:$0xff]  }
 0x28f   : > { %2852 = vmatprep.subr.bf16.mxu1 %v3115_v55  ;;  %v3140_v17 = vld [vmem:[%s3936_s27 + $0x4c] ss:$12 sps:$4 sm:$0xff]   ;;  %v3167_v19 = vld [vmem:[#allocation10 + $0x54] ss:$8 sps:$4 sm:$0xff]   ;;  %v3145_v24 = vld [vmem:[%s3936_s27 + $0x64] ss:$12 sps:$4 sm:$0xff]  }
 0x290   : > { %2709 = vmatpush3.bf16.msra.mxu0 %v3113_v53  ;;  %v3144_v18 = vld [vmem:[%s3936_s27 + $0x80] ss:$12 sps:$4 sm:$0xff]   ;;  %v3151_v20 = vld [vmem:[%s3936_s27 + $0x98] ss:$12 sps:$4 sm:$0xff]   ;;  %v3142_v23 = vld [vmem:[%s3936_s27 + $0x48] ss:$12 sps:$4 sm:$0xff]  }
 0x291   : > { %2710 = vmatprep.subr.bf16.mxu0 %v3114_v54  ;;  %v3165_v21 = vld [vmem:[#allocation10 + $0x50] ss:$8 sps:$4 sm:$0xff]   ;;  %v3170_v22 = vld [vmem:[#allocation10 + $0x44] ss:$8 sps:$4 sm:$0xff]   ;;  %v3168_v25 = vld [vmem:[#allocation10 + $0x40] ss:$8 sps:$4 sm:$0xff]  }
 0x292   : > { %2853 = vmatpush3.bf16.msra.mxu1 %v3115_v55  ;;  %v3152_v27 = vld [vmem:[%s3936_s27 + $0xb0] ss:$12 sps:$4 sm:$0xff]   ;;  %v3147_v28 = vld [vmem:[%s3936_s27 + $0x60] ss:$12 sps:$4 sm:$0xff]   ;;  %v3150_v30 = vld [vmem:[%s3936_s27 + $0x78] ss:$12 sps:$4 sm:$0xff]  }
 0x293   : > { %2854 = vmatprep.subr.bf16.mxu1 %v3118_v57  ;;  %v3148_v29 = vld [vmem:[%s3936_s27 + $0x7c] ss:$12 sps:$4 sm:$0xff]   ;;  %v3153_v31 = vld [vmem:[%s3936_s27 + $0x94] ss:$12 sps:$4 sm:$0xff]   ;;  %v3156_v33 = vld [vmem:[%s3936_s27 + $0xac] ss:$12 sps:$4 sm:$0xff]  }
 0x294   : > { %2711 = vmatpush3.bf16.msra.mxu0 %v3116_v56  ;;  %v3155_v32 = vld [vmem:[%s3936_s27 + $0x90] ss:$12 sps:$4 sm:$0xff]   ;;  %v3158_v34 = vld [vmem:[%s3936_s27 + $0xa8] ss:$12 sps:$4 sm:$0xff]   ;;  %v3176_v37 = vld [vmem:[#allocation10 + $0x24] ss:$8 sps:$4 sm:$0xff]  }
 0x295   : > { %2712 = vmatprep.subr.bf16.mxu0 %v3117_v58  ;;  %v3173_v35 = vld [vmem:[#allocation10 + $0x34] ss:$8 sps:$4 sm:$0xff]   ;;  %v3171_v36 = vld [vmem:[#allocation10 + $0x30] ss:$8 sps:$4 sm:$0xff]   ;;  %v3174_v38 = vld [vmem:[#allocation10 + $0x20] ss:$8 sps:$4 sm:$0xff]  }
 0x296   : > { %2855 = vmatpush3.bf16.msra.mxu1 %v3118_v57  ;;  %v3179_v39 = vld [vmem:[#allocation10 + $0x14] ss:$8 sps:$4 sm:$0xff]   ;;  %v3177_v40 = vld [vmem:[#allocation10 + $0x10] ss:$8 sps:$4 sm:$0xff]   ;;  %v3182_v41 = vld [vmem:[#allocation10 + $0x4] ss:$8 sps:$4 sm:$0xff]  }
 0x297   : > { %2856 = vmatprep.subr.bf16.mxu1 %v3121_v60  ;;  %v3180_v42 = vld [vmem:[#allocation10] ss:$8 sps:$4 sm:$0xff]  }
 0x298   : > { %2713 = vmatpush3.bf16.msra.mxu0 %v3119_v59  ;;  %v3967_v46 = vld [vmem:[%s4228_s2] ss:$0 sm:$0xff] }
 0x299   : > { %2714 = vmatprep.subr.bf16.mxu0 %v3120_v61 }
 0x29a   : > { %2857 = vmatpush3.bf16.msra.mxu1 %v3121_v60 }
 0x29b   : > { %2858 = vmatprep.subr.bf16.mxu1 %v3124_v0 }
 0x29c   : > { %2715 = vmatpush3.bf16.msra.mxu0 %v3122_v62 }
 0x29d   : > { %2716 = vmatprep.subr.bf16.mxu0 %v3123_v63 }
 0x29e   : > { %2859 = vmatpush3.bf16.msra.mxu1 %v3124_v0 }
 0x29f   : > { %2860 = vmatprep.subr.bf16.mxu1 %v3129_v4 }
 0x2a0   : > { %2717 = vmatpush3.bf16.msra.mxu0 %v3125_v2 }
 0x2a1   : > { %2032 = vmatprep.subr.bf16.mxu0 %v3161_v14 }
 0x2a2   : > { %2861 = vmatpush3.bf16.msra.mxu1 %v3129_v4 }
 0x2a3   : > { %1723 = vmatmul.mubr.bf16.vlgmr.msra.gmra.mxu0 %v3126_v5  ;;  %2878 = vmatprep.subr.bf16.mxu1 %v3161_v14 }
 0x2a4   : > { %1730 = vmatprep.mubr.bf16.mxu0 %v3132_v6  ;;  %2033 = vmatpush1.bf16.msra.mxu0 %v3159_v13 }
 0x2a5   : > { %2863 = vmatmul.mubr.bf16.vlgmr.msra.gmra.mxu1 %v3131_v7  ;;  %2034 = vmatprep.subr.bf16.mxu0 %v3164_v15 }
 0x2a6   : > { %2866 = vmatprep.mubr.bf16.mxu1 %v3135_v8  ;;  %2886 = vmatpush1.bf16.msra.mxu1 %v3159_v13 }
 0x2a7   : > { %2879 = vmatprep.subr.bf16.mxu1 %v3164_v15 }
 0x2a8   : > { %2035 = vmatpush1.bf16.msra.mxu0 %v3162_v26 }
 0x2a9   : > { %2036 = vmatprep.subr.bf16.mxu0 %v3167_v19 }
 0x2aa   : > { %2887 = vmatpush1.bf16.msra.mxu1 %v3162_v26 }
 0x2ab   : > { %1731 = vmatmul.mubr.bf16.gmra.mxu0 %v3134_v9  ;;  %2880 = vmatprep.subr.bf16.mxu1 %v3167_v19 }
 0x2ac   : > { %1738 = vmatprep.mubr.bf16.mxu0 %v3137_v10  ;;  %2037 = vmatpush1.bf16.msra.mxu0 %v3165_v21 }
 0x2ad   : > { %2867 = vmatmul.mubr.bf16.gmra.mxu1 %v3136_v11  ;;  %2038 = vmatprep.subr.bf16.mxu0 %v3170_v22 }
 0x2ae   : > { %2870 = vmatprep.mubr.bf16.mxu1 %v3143_v12  ;;  %2888 = vmatpush1.bf16.msra.mxu1 %v3165_v21 }
 0x2af   : > { %2881 = vmatprep.subr.bf16.mxu1 %v3170_v22 }
 0x2b0   : > { %2039 = vmatpush1.bf16.msra.mxu0 %v3168_v25 }
 0x2b1   : > { %2040 = vmatprep.subr.bf16.mxu0 %v3173_v35 }
 0x2b2   : > { %2889 = vmatpush1.bf16.msra.mxu1 %v3168_v25 }
 0x2b3   : > { %1739 = vmatmul.mubr.bf16.gmra.mxu0 %v3139_v16  ;;  %2882 = vmatprep.subr.bf16.mxu1 %v3173_v35 }
 0x2b4   : > { %1746 = vmatprep.mubr.bf16.mxu0 %v3140_v17  ;;  %2041 = vmatpush1.bf16.msra.mxu0 %v3171_v36 }
 0x2b5   : > { %2871 = vmatmul.mubr.bf16.gmra.mxu1 %v3144_v18  ;;  %2042 = vmatprep.subr.bf16.mxu0 %v3176_v37 }
 0x2b6   : > { %2874 = vmatprep.mubr.bf16.mxu1 %v3151_v20  ;;  %2890 = vmatpush1.bf16.msra.mxu1 %v3171_v36 }
 0x2b7   : > { %2883 = vmatprep.subr.bf16.mxu1 %v3176_v37 }
 0x2b8   : > { %2043 = vmatpush1.bf16.msra.mxu0 %v3174_v38 }
 0x2b9   : > { %2044 = vmatprep.subr.bf16.mxu0 %v3179_v39 }
 0x2ba   : > { %2891 = vmatpush1.bf16.msra.mxu1 %v3174_v38 }
 0x2bb   : > { %1747 = vmatmul.mubr.bf16.gmra.mxu0 %v3142_v23  ;;  %2884 = vmatprep.subr.bf16.mxu1 %v3179_v39 }
 0x2bc   : > { %1754 = vmatprep.mubr.bf16.mxu0 %v3145_v24  ;;  %2045 = vmatpush1.bf16.msra.mxu0 %v3177_v40 }
 0x2bd   : > { %2875 = vmatmul.mubr.bf16.gmra.mxu1 %v3152_v27  ;;  %2046 = vmatprep.subr.bf16.mxu0 %v3182_v41 }
 0x2be   : > { %2892 = vmatpush1.bf16.msra.mxu1 %v3177_v40  ;;  %2084 = vmatprep.mubr.bf16.mxu1 %v3460_v43 }
 0x2bf   : > { %2885 = vmatprep.subr.bf16.mxu1 %v3182_v41 }
 0x2c0   : > { %2047 = vmatpush1.bf16.msra.mxu0 %v3180_v42 }
 0x2c2   : > { %2893 = vmatpush1.bf16.msra.mxu1 %v3180_v42 }
 0x2c3   : > { %1755 = vmatmul.mubr.bf16.gmra.mxu0 %v3147_v28 }
 0x2c4   : > { %1762 = vmatprep.mubr.bf16.mxu0 %v3148_v29 }
 0x2cb   : > { %1763 = vmatmul.mubr.bf16.gmra.mxu0 %v3150_v30 }
 0x2cc   : > { %1770 = vmatprep.mubr.bf16.mxu0 %v3153_v31 }
 0x2d3   : > { %1771 = vmatmul.mubr.bf16.gmra.mxu0 %v3155_v32 }
 0x2d4   : > { %1778 = vmatprep.mubr.bf16.mxu0 %v3156_v33 }
 0x2db   : > { %1779 = vmatmul.mubr.bf16.gmra.mxu0 %v3158_v34 }
 0x2dc   : > { %2064 = vmatprep.mubr.bf16.mxu0 %v3460_v43 }
 0x363   : > { %v2718_v44 = vpop.f32.mrf.mxu0 }
 0x365   : > { %v2719_v45 = vpop.f32.mrf.mxu0  ;;  %v2864_v48 = vpop.f32.mrf.mxu1 }
 0x366   : > { %v2720_v47 = vadd.f32 %v2719_v45, %v2718_v44 }
 0x367   : > { %v2721_v49 = vpop.f32.mrf.mxu0  ;;  %v1821_v51 = vpop.f32.mrf.mxu1 }
 0x368   : > { %v1725_v50 = vadd.f32 %v2720_v47, %v3967_v46 }
 0x369   : > { %v2722_v52 = vpop.f32.mrf.mxu0  ;;  %v2865_v55 = vpop.f32.mrf.mxu1 }
 0x36a   : > { %v2723_v53 = vadd.f32 %v2722_v52, %v2721_v49  ;;  %v1822_v54 = vadd.f32 %v1821_v51, %v1725_v50 }
 0x36b   : > { %v2724_v56 = vpop.f32.mrf.mxu0  ;;  %v1824_v58 = vpop.f32.mrf.mxu1 }
 0x36c   : > { %1884 = vst [vmem:[%s3717_s25] sm:$0xff] %v1822_v54  ;;  %v1728_v57 = vadd.f32 %v2723_v53, %v3967_v46  ;;  %v1900_v63 = vmax.f32 %v1822_v54, 0.0 }
 0x36d   : > { %v2725_v59 = vpop.f32.mrf.mxu0  ;;  %v2868_v3 = vpop.f32.mrf.mxu1 }
 0x36e   : > { %v2726_v60 = vadd.f32 %v2725_v59, %v2724_v56  ;;  %v1825_v61 = vadd.f32 %v1824_v58, %v1728_v57 }
 0x36f   : > { %v2727_v62 = vpop.f32.mrf.mxu0  ;;  %v1837_v9 = vpop.f32.mrf.mxu1 }
 0x370   : > { %v1733_v0 = vadd.f32 %v2726_v60, %v3967_v46  ;;  %1885 = vst [vmem:[%s3717_s25 + $0x8] sm:$0xff] %v1825_v61  ;;  %v1901_v1 = vmax.f32 %v1825_v61, 0.0 }
 0x371   : > { %v2728_v2 = vpop.f32.mrf.mxu0  ;;  %v2869_v17 = vpop.f32.mrf.mxu1 }
 0x372   : > { %v1830_v4 = vadd.f32 %v2864_v48, %v1733_v0  ;;  %v1916_v5 = vpack.c.bf16 %v1901_v1, %v1900_v63  ;;  %v2729_v6 = vadd.f32 %v2728_v2, %v2727_v62 }
 0x373   : > { %v2730_v7 = vpop.f32.mrf.mxu0  ;;  %v1840_v23 = vpop.f32.mrf.mxu1 }
 0x374   : > { %1886 = vst [vmem:[%s3717_s25 + $0x10] sm:$0xff] %v1830_v4  ;;  %v1736_v8 = vadd.f32 %v2729_v6, %v3967_v46  ;;  %2065 = vmatmul.mubr.bf16.vlgmr.msra.gmra.mxu0 %v1916_v5  ;;  %v1902_v15 = vmax.f32 %v1830_v4, 0.0 }
 0x375   : > { %v2731_v10 = vpop.f32.mrf.mxu0  ;;  %2074 = vmatprep.mubr.bf16.mxu0 %v3460_v43  ;;  %v2872_v33 = vpop.f32.mrf.mxu1 }
 0x376   : > { %v1833_v11 = vadd.f32 %v2865_v55, %v1736_v8  ;;  %v2732_v12 = vadd.f32 %v2731_v10, %v2730_v7 }
 0x377   : > { %v2733_v13 = vpop.f32.mrf.mxu0  ;;  %v1853_v39 = vpop.f32.mrf.mxu1 }
 0x378   : > { %1887 = vst [vmem:[%s3717_s25 + $0x18] sm:$0xff] %v1833_v11  ;;  %v1741_v14 = vadd.f32 %v2732_v12, %v3967_v46  ;;  %v1903_v16 = vmax.f32 %v1833_v11, 0.0 }
 0x379   : > { %v2734_v18 = vpop.f32.mrf.mxu0  ;;  %v2873_v49 = vpop.f32.mrf.mxu1 }
 0x37a   : > { %v1838_v26 = vadd.f32 %v1837_v9, %v1741_v14  ;;  %v2735_v19 = vadd.f32 %v2734_v18, %v2733_v13  ;;  %v1917_v20 = vpack.c.bf16 %v1903_v16, %v1902_v15 }
 0x37b   : > { %v2736_v21 = vpop.f32.mrf.mxu0  ;;  %v1856_v56 = vpop.f32.mrf.mxu1 }
 0x37c   : > { %1888 = vst [vmem:[%s3717_s25 + $0x20] sm:$0xff] %v1838_v26  ;;  %v1744_v22 = vadd.f32 %v2735_v19, %v3967_v46  ;;  %2075 = vmatmul.mubr.bf16.gmra.mxu0 %v1917_v20  ;;  %v1904_v29 = vmax.f32 %v1838_v26, 0.0 }
 0x37d   : > { %v2737_v24 = vpop.f32.mrf.mxu0  ;;  %v2876_v1 = vpop.f32.mrf.mxu1 }
 0x37e   : > { %v1841_v25 = vadd.f32 %v1840_v23, %v1744_v22  ;;  %v2738_v27 = vadd.f32 %v2737_v24, %v2736_v21 }
 0x37f   : > { %v2739_v28 = vpop.f32.mrf.mxu0  ;;  %v1869_v7 = vpop.f32.mrf.mxu1 }
 0x380   : > { %1889 = vst [vmem:[%s3717_s25 + $0x28] sm:$0xff] %v1841_v25  ;;  %v1905_v30 = vmax.f32 %v1841_v25, 0.0  ;;  %v1749_v31 = vadd.f32 %v2738_v27, %v3967_v46 }
 0x381   : > { %v2740_v32 = vpop.f32.mrf.mxu0  ;;  %v2877_v15 = vpop.f32.mrf.mxu1 }
 0x382   : > { %v1918_v34 = vpack.c.bf16 %v1905_v30, %v1904_v29  ;;  %v1846_v35 = vadd.f32 %v2868_v3, %v1749_v31  ;;  %v2741_v36 = vadd.f32 %v2740_v32, %v2739_v28 }
 0x383   : > { %v2742_v37 = vpop.f32.mrf.mxu0  ;;  %v1872_v21 = vpop.f32.mrf.mxu1 }
 0x384   : > { %1890 = vst [vmem:[%s3717_s25 + $0x30] sm:$0xff] %v1846_v35  ;;  %v1752_v38 = vadd.f32 %v2741_v36, %v3967_v46  ;;  %2085 = vmatmul.mubr.bf16.vlgmr.msra.gmra.mxu1 %v1918_v34  ;;  %v1906_v47 = vmax.f32 %v1846_v35, 0.0 }
 0x385   : > { %v2743_v40 = vpop.f32.mrf.mxu0  ;;  %2094 = vmatprep.mubr.bf16.mxu1 %v3460_v43 }
 0x386   : > { %v1849_v41 = vadd.f32 %v2869_v17, %v1752_v38  ;;  %v2744_v42 = vadd.f32 %v2743_v40, %v2742_v37 }
 0x387   : > { %v2745_v44 = vpop.f32.mrf.mxu0 }
 0x388   : > { %1891 = vst [vmem:[%s3717_s25 + $0x38] sm:$0xff] %v1849_v41  ;;  %v1757_v45 = vadd.f32 %v2744_v42, %v3967_v46  ;;  %v1907_v48 = vmax.f32 %v1849_v41, 0.0  ;;  %v1940_v42 = vld [vmem:[%s4229_s7] sm:$0x3] }
 0x389   : > { %v2746_v50 = vpop.f32.mrf.mxu0 }
 0x38a   : > { %v1854_v51 = vadd.f32 %v1853_v39, %v1757_v45  ;;  %v2747_v52 = vadd.f32 %v2746_v50, %v2745_v44  ;;  %v1919_v53 = vpack.c.bf16 %v1907_v48, %v1906_v47  ;;  %v1942_v39 = vlaneseq }
 0x38b   : > { %v2748_v54 = vpop.f32.mrf.mxu0 }
 0x38c   : > { %1892 = vst [vmem:[%s3717_s25 + $0x40] sm:$0xff] %v1854_v51  ;;  %v1760_v55 = vadd.f32 %v2747_v52, %v3967_v46  ;;  %2095 = vmatmul.mubr.bf16.gmra.mxu1 %v1919_v53  ;;  %v1908_v62 = vmax.f32 %v1854_v51, 0.0  ;;  %v1943_v40 = vshrl.u32 %v1942_v39, 7 }
 0x38d   : > { %v2749_v57 = vpop.f32.mrf.mxu0  ;;  %2104 = vmatprep.mubr.bf16.mxu1 %v3460_v43 }
 0x38e   : > { %v1857_v58 = vadd.f32 %v1856_v56, %v1760_v55  ;;  %v2750_v59 = vadd.f32 %v2749_v57, %v2748_v54  ;;  %v1944_v41 = vsub.s32 0, %v1943_v40 }
 0x38f   : > { %v2751_v60 = vpop.f32.mrf.mxu0 }
 0x390   : > { %1893 = vst [vmem:[%s3717_s25 + $0x48] sm:$0xff] %v1857_v58  ;;  %v1765_v61 = vadd.f32 %v2750_v59, %v3967_v46  ;;  %v1909_v63 = vmax.f32 %v1857_v58, 0.0  ;;  %v4010_v44 = vrot.slane %v1940_v42, %v1944_v41 }
 0x391   : > { %v2752_v0 = vpop.f32.mrf.mxu0 }
 0x392   : > { %v1862_v2 = vadd.f32 %v2872_v33, %v1765_v61  ;;  %v2753_v3 = vadd.f32 %v2752_v0, %v2751_v60  ;;  %v1920_v4 = vpack.c.bf16 %v1909_v63, %v1908_v62 }
 0x393   : > { %v2754_v5 = vpop.f32.mrf.mxu0 }
 0x394   : > { %1894 = vst [vmem:[%s3717_s25 + $0x50] sm:$0xff] %v1862_v2  ;;  %v1768_v6 = vadd.f32 %v2753_v3, %v3967_v46  ;;  %2105 = vmatmul.mubr.bf16.gmra.mxu1 %v1920_v4  ;;  %v1910_v13 = vmax.f32 %v1862_v2, 0.0 }
 0x395   : > { %v2755_v8 = vpop.f32.mrf.mxu0  ;;  %2114 = vmatprep.mubr.bf16.mxu1 %v3460_v43 }
 0x396   : > { %v1865_v9 = vadd.f32 %v2873_v49, %v1768_v6  ;;  %v2756_v10 = vadd.f32 %v2755_v8, %v2754_v5 }
 0x397   : > { %v2757_v11 = vpop.f32.mrf.mxu0 }
 0x398   : > { %1895 = vst [vmem:[%s3717_s25 + $0x58] sm:$0xff] %v1865_v9  ;;  %v1773_v12 = vadd.f32 %v2756_v10, %v3967_v46  ;;  %v1911_v14 = vmax.f32 %v1865_v9, 0.0 }
 0x399   : > { %v2758_v16 = vpop.f32.mrf.mxu0 }
 0x39a   : > { %v1870_v17 = vadd.f32 %v1869_v7, %v1773_v12  ;;  %v2759_v18 = vadd.f32 %v2758_v16, %v2757_v11  ;;  %v1921_v26 = vpack.c.bf16 %v1911_v14, %v1910_v13 }
 0x39b   : > { %v2760_v19 = vpop.f32.mrf.mxu0 }
 0x39c   : > { %1896 = vst [vmem:[%s3717_s25 + $0x60] sm:$0xff] %v1870_v17  ;;  %v1776_v20 = vadd.f32 %v2759_v18, %v3967_v46  ;;  %2115 = vmatmul.mubr.bf16.gmra.mxu1 %v1921_v26  ;;  %v1912_v28 = vmax.f32 %v1870_v17, 0.0 }
 0x39d   : > { %v2761_v22 = vpop.f32.mrf.mxu0  ;;  %2124 = vmatprep.mubr.bf16.mxu1 %v3460_v43 }
 0x39e   : > { %v1873_v23 = vadd.f32 %v1872_v21, %v1776_v20  ;;  %v2762_v24 = vadd.f32 %v2761_v22, %v2760_v19 }
 0x39f   : > { %v2763_v25 = vpop.f32.mrf.mxu0 }
 0x3a0   : > { %1897 = vst [vmem:[%s3717_s25 + $0x68] sm:$0xff] %v1873_v23  ;;  %v1781_v27 = vadd.f32 %v2762_v24, %v3967_v46  ;;  %v1913_v29 = vmax.f32 %v1873_v23, 0.0 }
 0x3a1   : > { %v2764_v30 = vpop.f32.mrf.mxu0 }
 0x3a2   : > { %v1878_v31 = vadd.f32 %v2876_v1, %v1781_v27  ;;  %v2765_v32 = vadd.f32 %v2764_v30, %v2763_v25  ;;  %v1922_v33 = vpack.c.bf16 %v1913_v29, %v1912_v28 }
 0x3a4   : > { %1898 = vst [vmem:[%s3717_s25 + $0x70] sm:$0xff] %v1878_v31  ;;  %v1784_v34 = vadd.f32 %v2765_v32, %v3967_v46  ;;  %2125 = vmatmul.mubr.bf16.gmra.mxu1 %v1922_v33  ;;  %v1914_v36 = vmax.f32 %v1878_v31, 0.0  ;;  %v1948_v46 = vsub.s32 1, %v1943_v40 }
 0x3a5   : > { %2134 = vmatprep.mubr.bf16.mxu1 %v3460_v43 }
 0x3a6   : > { %v1881_v35 = vadd.f32 %v2877_v15, %v1784_v34  ;;  %v4012_v43 = vrot.slane %v1940_v42, %v1948_v46 }
 0x3a8   : > { %1899 = vst [vmem:[%s3717_s25 + $0x78] sm:$0xff] %v1881_v35  ;;  %v1915_v37 = vmax.f32 %v1881_v35, 0.0 }
 0x3aa   : > { %v1923_v38 = vpack.c.bf16 %v1915_v37, %v1914_v36 }
 0x3ac   : > { %2135 = vmatmul.mubr.bf16.gmra.mxu1 %v1923_v38 }
 0x434   : > { %v2066_v45 = vpop.f32.mrf.mxu0 }
 0x435   : > { %v2067_v47 = vadd.f32 %v2066_v45, %v4010_v44 }
 0x436   : > { %v2068_v48 = vpop.f32.mrf.mxu0 }
 0x437   : > { %2145 = vst [vmem:[%s3719_s14] sm:$0xff] %v2067_v47  ;;  %v2069_v49 = vadd.f32 %v2068_v48, %v4012_v43 }
 0x438   : > { %v2070_v50 = vpop.f32.mrf.mxu0 }
 0x439   : > { %2146 = vst [vmem:[%s3719_s14 + $0x8] sm:$0xff] %v2069_v49  ;;  %v2071_v51 = vadd.f32 %v2070_v50, %v4010_v44 }
 0x43a   : > { %v2072_v52 = vpop.f32.mrf.mxu0 }
 0x43b   : > { %2147 = vst [vmem:[%s3719_s14 + $0x10] sm:$0xff] %v2071_v51  ;;  %v2073_v53 = vadd.f32 %v2072_v52, %v4012_v43 }
 0x43c   : > { %v2076_v54 = vpop.f32.mrf.mxu0 }
 0x43d   : > { %2148 = vst [vmem:[%s3719_s14 + $0x18] sm:$0xff] %v2073_v53  ;;  %v2077_v55 = vadd.f32 %v2076_v54, %v4010_v44 }
 0x43e   : > { %v2078_v56 = vpop.f32.mrf.mxu0 }
 0x43f   : > { %2149 = vst [vmem:[%s3719_s14 + $0x20] sm:$0xff] %v2077_v55  ;;  %v2079_v57 = vadd.f32 %v2078_v56, %v4012_v43 }
 0x440   : > { %v2080_v58 = vpop.f32.mrf.mxu0 }
 0x441   : > { %2150 = vst [vmem:[%s3719_s14 + $0x28] sm:$0xff] %v2079_v57  ;;  %v2081_v59 = vadd.f32 %v2080_v58, %v4010_v44 }
 0x442   : > { %v2082_v60 = vpop.f32.mrf.mxu0 }
 0x443   : > { %2151 = vst [vmem:[%s3719_s14 + $0x30] sm:$0xff] %v2081_v59  ;;  %v2083_v61 = vadd.f32 %v2082_v60, %v4012_v43 }
 0x444   : > { %v2086_v62 = vpop.f32.mrf.mxu1 }
 0x445   : > { %2152 = vst [vmem:[%s3719_s14 + $0x38] sm:$0xff] %v2083_v61  ;;  %v2087_v63 = vadd.f32 %v2086_v62, %v4010_v44 }
 0x446   : > { %v2088_v0 = vpop.f32.mrf.mxu1 }
 0x447   : > { %2153 = vst [vmem:[%s3719_s14 + $0x40] sm:$0xff] %v2087_v63  ;;  %v2089_v1 = vadd.f32 %v2088_v0, %v4012_v43 }
 0x448   : > { %v2090_v2 = vpop.f32.mrf.mxu1 }
 0x449   : > { %2154 = vst [vmem:[%s3719_s14 + $0x48] sm:$0xff] %v2089_v1  ;;  %v2091_v3 = vadd.f32 %v2090_v2, %v4010_v44 }
 0x44a   : > { %v2092_v4 = vpop.f32.mrf.mxu1 }
 0x44b   : > { %2155 = vst [vmem:[%s3719_s14 + $0x50] sm:$0xff] %v2091_v3  ;;  %v2093_v5 = vadd.f32 %v2092_v4, %v4012_v43 }
 0x44c   : > { %v2096_v6 = vpop.f32.mrf.mxu1 }
 0x44d   : > { %2156 = vst [vmem:[%s3719_s14 + $0x58] sm:$0xff] %v2093_v5  ;;  %v2097_v7 = vadd.f32 %v2096_v6, %v4010_v44 }
 0x44e   : > { %v2098_v8 = vpop.f32.mrf.mxu1 }
 0x44f   : > { %2157 = vst [vmem:[%s3719_s14 + $0x60] sm:$0xff] %v2097_v7  ;;  %v2099_v9 = vadd.f32 %v2098_v8, %v4012_v43 }
 0x450   : > { %v2100_v10 = vpop.f32.mrf.mxu1 }
 0x451   : > { %2158 = vst [vmem:[%s3719_s14 + $0x68] sm:$0xff] %v2099_v9  ;;  %v2101_v11 = vadd.f32 %v2100_v10, %v4010_v44 }
 0x452   : > { %v2102_v12 = vpop.f32.mrf.mxu1 }
 0x453   : > { %2159 = vst [vmem:[%s3719_s14 + $0x70] sm:$0xff] %v2101_v11  ;;  %v2103_v13 = vadd.f32 %v2102_v12, %v4012_v43 }
 0x454   : > { %v2106_v14 = vpop.f32.mrf.mxu1 }
 0x455   : > { %2160 = vst [vmem:[%s3719_s14 + $0x78] sm:$0xff] %v2103_v13  ;;  %v2107_v15 = vadd.f32 %v2106_v14, %v4010_v44 }
 0x456   : > { %v2108_v16 = vpop.f32.mrf.mxu1 }
 0x457   : > { %2161 = vst [vmem:[%s3719_s14 + $0x80] sm:$0xff] %v2107_v15  ;;  %v2109_v17 = vadd.f32 %v2108_v16, %v4012_v43 }
 0x458   : > { %v2110_v18 = vpop.f32.mrf.mxu1 }
 0x459   : > { %2162 = vst [vmem:[%s3719_s14 + $0x88] sm:$0xff] %v2109_v17  ;;  %v2111_v26 = vadd.f32 %v2110_v18, %v4010_v44 }
 0x45a   : > { %v2112_v19 = vpop.f32.mrf.mxu1 }
 0x45b   : > { %2163 = vst [vmem:[%s3719_s14 + $0x90] sm:$0xff] %v2111_v26  ;;  %v2113_v20 = vadd.f32 %v2112_v19, %v4012_v43 }
 0x45c   : > { %v2116_v21 = vpop.f32.mrf.mxu1 }
 0x45d   : > { %2164 = vst [vmem:[%s3719_s14 + $0x98] sm:$0xff] %v2113_v20  ;;  %v2117_v22 = vadd.f32 %v2116_v21, %v4010_v44 }
 0x45e   : > { %v2118_v23 = vpop.f32.mrf.mxu1 }
 0x45f   : > { %2165 = vst [vmem:[%s3719_s14 + $0xa0] sm:$0xff] %v2117_v22  ;;  %v2119_v24 = vadd.f32 %v2118_v23, %v4012_v43 }
 0x460   : > { %v2120_v25 = vpop.f32.mrf.mxu1 }
 0x461   : > { %2166 = vst [vmem:[%s3719_s14 + $0xa8] sm:$0xff] %v2119_v24  ;;  %v2121_v27 = vadd.f32 %v2120_v25, %v4010_v44 }
 0x462   : > { %v2122_v28 = vpop.f32.mrf.mxu1 }
 0x463   : > { %2167 = vst [vmem:[%s3719_s14 + $0xb0] sm:$0xff] %v2121_v27  ;;  %v2123_v29 = vadd.f32 %v2122_v28, %v4012_v43 }
 0x464   : > { %v2126_v30 = vpop.f32.mrf.mxu1 }
 0x465   : > { %2168 = vst [vmem:[%s3719_s14 + $0xb8] sm:$0xff] %v2123_v29  ;;  %v2127_v31 = vadd.f32 %v2126_v30, %v4010_v44 }
 0x466   : > { %v2128_v32 = vpop.f32.mrf.mxu1 }
 0x467   : > { %2169 = vst [vmem:[%s3719_s14 + $0xc0] sm:$0xff] %v2127_v31  ;;  %v2129_v33 = vadd.f32 %v2128_v32, %v4012_v43 }
 0x468   : > { %v2130_v34 = vpop.f32.mrf.mxu1 }
 0x469   : > { %2170 = vst [vmem:[%s3719_s14 + $0xc8] sm:$0xff] %v2129_v33  ;;  %v2131_v35 = vadd.f32 %v2130_v34, %v4010_v44 }
 0x46a   : > { %v2132_v36 = vpop.f32.mrf.mxu1 }
 0x46b   : > { %2171 = vst [vmem:[%s3719_s14 + $0xd0] sm:$0xff] %v2131_v35  ;;  %v2133_v37 = vadd.f32 %v2132_v36, %v4012_v43 }
 0x46c   : > { %v2136_v38 = vpop.f32.mrf.mxu1 }
 0x46d   : > { %2172 = vst [vmem:[%s3719_s14 + $0xd8] sm:$0xff] %v2133_v37  ;;  %v2137_v39 = vadd.f32 %v2136_v38, %v4010_v44 }
 0x46e   : > { %v2138_v40 = vpop.f32.mrf.mxu1 }
 0x46f   : > { %2173 = vst [vmem:[%s3719_s14 + $0xe0] sm:$0xff] %v2137_v39  ;;  %v2139_v41 = vadd.f32 %v2138_v40, %v4012_v43 }
 0x470   : > { %v2140_v42 = vpop.f32.mrf.mxu1 }
 0x471   : > { %2174 = vst [vmem:[%s3719_s14 + $0xe8] sm:$0xff] %v2139_v41  ;;  %v2141_v46 = vadd.f32 %v2140_v42, %v4010_v44 }
 0x472   : > { %v2142_v45 = vpop.f32.mrf.mxu1 }
 0x473   : > { %2175 = vst [vmem:[%s3719_s14 + $0xf0] sm:$0xff] %v2141_v46  ;;  %v2143_v47 = vadd.f32 %v2142_v45, %v4012_v43 }
 0x475   : > { %2176 = vst [vmem:[%s3719_s14 + $0xf8] sm:$0xff] %v2143_v47 }
 0x476 PF: > { %s4230_s18 = sld [smem:[#allocation23_spill]]  ;;  %s2556_s4 = sshll.u32 %s3431_s11, 11 }
 0x477   : > { %s4231_s26 = sld [smem:[#allocation31_spill]]  ;;  %s2196_s16 = sshll.u32 %s3717_s25, 4  ;;  %s4085_s16 = int_to_ptr.vmem [resolvable:$true] %s2196_s16 }
 0x478   : > { %s2178_s17 = scalar_lea.sflag [#allocation6], %s3712_s13  ;;  %s3289_s12 = scalar_lea.vmem %s4085_s16, 2048 }
 0x479   : > { %p3290_p1 = scmp.ne.s32.totalorder %s4085_s16, %s3289_s12  ;;  %s3461_s22 = smov [#allocation12]  }
 0x47a   : > { %s3293_s27 = sshll.u32 %s3461_s22, 4  ;;  %s3294_s27 = int_to_ptr.vmem [resolvable:$false] %s3293_s27 }
 0x47b   : > { %s3295_s8 = scalar_lea.vmem %s3294_s27, 4096  ;;  %p3296_p13 = scmp.lt.s32.totalorder %s4085_s16, %s3294_s27 }
 0x47c   : > { %p4232_p3 = scmp.ne.s32.totalorder %s4230_s18, 0  ;;  %p3297_p4 = scmp.lt.s32.totalorder %s3295_s8, %s3289_s12 }
 0x47d   : > { %s4082_s19 = scalar_lea.hbm %s4231_s26, %s2556_s4 }
 0x47e   : > { %p3291_p7 = pnand %p3290_p1, %p4232_p3  ;;  %p3298_p6 = por %p3297_p4, %p3296_p13 }
 0x480   : > { %p3292_p0 = pneg %p3291_p7 }
 0x482   : > { %p3299_p5 = pnand %p3298_p6, %p3292_p0 }
 0x484   : > { %3302 = shalt.err (!%p3299_p5)
}
 0x485   : > { %s3303_s25 = scalar_lea.hbm %s4082_s19, 2048  ;;  %s3307_s20 = scalar_lea.hbm %s4231_s26, 6144 }
 0x486   : > { %p3304_p8 = scmp.ne.s32.totalorder %s4082_s19, %s3303_s25  ;;  %p3308_p2 = scmp.lt.s32.totalorder %s4082_s19, %s4231_s26 }
 0x487   : > { %p3309_p11 = scmp.lt.s32.totalorder %s3307_s20, %s3303_s25 }
 0x488   : > { %p3305_p9 = pnand %p3304_p8, %p4232_p3 }
 0x489   : > { %p3310_p10 = por %p3309_p11, %p3308_p2 }
 0x48a   : > { %p3306_p12 = pneg %p3305_p9 }
 0x48c   : > { %p3311_p1 = pnand %p3310_p10, %p3306_p12 }
 0x48e   : > { %3314 = shalt.err (!%p3311_p1)
}
 0x48f   : > { %s3462_s4 = smov 128   ;;  %s3463_s3 = smov 8  }
 0x490   : > { %2911 = dma.vmem_to_hbm [thread:$0]  (%p4232_p3), %s4085_s16, 2048, %s4082_s19, %s2178_s17, %s3462_s4, %s3462_s4, %s3463_s3  }
 0x491   : > { %s2558_s5 = sshll.u32 %s3431_s11, 12  ;;  %s2213_s12 = sshll.u32 %s3719_s14, 4  ;;  %s4117_s12 = int_to_ptr.vmem [resolvable:$true] %s2213_s12 }
 0x492   : > { %s4233_s8 = sld [smem:[#allocation32_spill]]  ;;  %s2183_s1 = scalar_lea.sflag [#allocation14], %s3712_s13 }
 0x493   : > { %s3315_s2 = scalar_lea.vmem %s4117_s12, 4096  ;;  %s3464_s20 = smov [#allocation13]  }
 0x494   : > { %p3316_p7 = scmp.ne.s32.totalorder %s4117_s12, %s3315_s2  ;;  %s3319_s19 = sshll.u32 %s3464_s20, 4  ;;  %s3320_s19 = int_to_ptr.vmem [resolvable:$false] %s3319_s19 }
 0x495   : > { %s3321_s11 = scalar_lea.vmem %s3320_s19, 8192  ;;  %p3322_p4 = scmp.lt.s32.totalorder %s4117_s12, %s3320_s19 }
 0x496   : > { %p3317_p0 = pnand %p3316_p7, %p4232_p3  ;;  %p3323_p6 = scmp.lt.s32.totalorder %s3321_s11, %s3315_s2 }
 0x498   : > { %s4115_s25 = scalar_lea.hbm %s4233_s8, %s2558_s5  ;;  %p3318_p13 = pneg %p3317_p0 }
 0x499   : > { %p3324_p5 = por %p3323_p6, %p3322_p4 }
 0x49b   : > { %p3325_p8 = pnand %p3324_p5, %p3318_p13 }
 0x49d   : > { %3328 = shalt.err (!%p3325_p8)
}
 0x49e   : > { %s3329_s14 = scalar_lea.hbm %s4115_s25, 4096  ;;  %s3333_s23 = scalar_lea.hbm %s4233_s8, 12288 }
 0x49f   : > { %p3330_p9 = scmp.ne.s32.totalorder %s4115_s25, %s3329_s14  ;;  %p3334_p11 = scmp.lt.s32.totalorder %s4115_s25, %s4233_s8 }
 0x4a0   : > { %p3335_p10 = scmp.lt.s32.totalorder %s3333_s23, %s3329_s14 }
 0x4a1   : > { %p3331_p12 = pnand %p3330_p9, %p4232_p3 }
 0x4a2   : > { %p3336_p1 = por %p3335_p10, %p3334_p11 }
 0x4a3   : > { %p3332_p2 = pneg %p3331_p12 }
 0x4a5   : > { %p3337_p7 = pnand %p3336_p1, %p3332_p2 }
 0x4a7   : > { %3340 = shalt.err (!%p3337_p7)
}
 0x4a8   : > { %s3465_s3 = smov 256   ;;  %s3466_s5 = smov 16  }
 0x4a9   : > { %2912 = dma.vmem_to_hbm [thread:$0]  (%p4232_p3), %s4117_s12, 4096, %s4115_s25, %s2183_s1, %s3465_s3, %s3465_s3, %s3466_s5  }
 0x4aa PF: > { %s4234_s22 = sld [smem:[#allocation20_spill]]  ;;  %p2943_p0 = scmp.ge.s32.totalorder %s3447_s15, 2 }
 0x4ab   : > { %s4235_s27 = sld [smem:[#allocation24_spill]] }
 0x4b0   : > { %s2228_s2 = sand.u32 1, %s4234_s22  }
 0x4b1   : > { %p4236_p13 = scmp.ne.s32.totalorder %s4235_s27, 0  ;;  %s2229_s20 = scalar_lea.sflag [#allocation6], %s2228_s2 }
 0x4b3   : > { %p2930_p4 = pnand %p2943_p0, %p4236_p13 }
 0x4b5   : > { %p2931_p6 = pneg %p2930_p4 }
 0x4b7   : > { %3398 = dma.done.wait (%p2931_p6), %s2229_s20, 2048  }
 0x4b8   : > { %3400 = vsyncadd (%p2931_p6), %s2229_s20, 4294965248  ;;  %s2238_s19 = scalar_lea.sflag [#allocation14], %s2228_s2 }
 0x4b9   : > { %3402 = dma.done.wait (%p2931_p6), %s2238_s19, 4096  }
 0x4ba   : > { %3404 = vsyncadd (%p2931_p6), %s2238_s19, 4294963200  ;;  %s30_s15 = sadd.s32 1, %s3447_s15   ;;  %s4237_s11 = sld [smem:[#allocation21_spill]] }
 0x4bb   : > { %p27_p5 = scmp.ge.s32.totalorder %s30_s15, 8   ;;  %s4238_s12 = sld [smem:[#allocation22_spill]] }
 0x4bc   : > { %s4239_s18 = smov %s4253_s30  ;;  %s4240_s27 = smov %s3411_s28 }
 0x4bd   : > { %s4241_s28 = smov %s3415_s29  ;;  %s4242_s29 = smov %s3659_s21 }
 0x4be   : > { %s4243_s30 = smov %s3423_s9  ;;  %s4244_s9 = smov %s3427_s10 }
 0x4bf   : > { %s4245_s10 = smov %s3662_s6  ;;  %s4246_s13 = smov %s4249_s24 }
 0x4c0   : > { %s4247_s14 = smov %s4239_s18  ;;  %29 = sbr.rel (!%p27_p5) target bundleno = 22 (0x16), region = 133 }
 0x4c5   :  { %2243 = vsyncpa [#allocation5], 1 }
 0x4c6   :  { %2245 = vsyncpa [#allocation5 + $0x1], 1 }
 0x4c7   :  { %2246 = vsyncpa [#allocation8], 1 }
 0x4c8   :  { %2247 = vsyncpa [#allocation11], 1 }
 0x4c9   :  { %2248 = vsyncpa [#allocation6], 1 }
 0x4ca   :  { %2250 = vsyncpa [#allocation6 + $0x1], 1 }
 0x4cb   :  { %2251 = vsyncpa [#allocation14], 1 }
 0x4cc   :  { %2253 = vsyncpa [#allocation14 + $0x1], 1 }

</bundles_post_ra>
